<compile_context>
chip_gen: v6e
topology: v6e:2x2x1
jax: 0.10.0
libtpu: 0.0.40
codegen_flags: <defaults>
</compile_context>

<pallas_src>
import functools

import jax
import jax.numpy as jnp
import numpy as np
from jax.experimental import pallas as pl
from jax.experimental.pallas import tpu as pltpu

LRELU_SLOPE = 0.01          # nn.LeakyReLU() default negative_slope (as used by this module)
K = 3                       # kernel size used by ResidualStack
DILATIONS = (1, 3, 9)       # res_1 / res_2 / res_3 first-conv dilations
LANE = 128                  # TPU lane width


# ---------------------------------------------------------------------------
# Fused Pallas kernel: the entire residual stack, one batch element per grid step.
# ---------------------------------------------------------------------------
def _make_stack_kernel(C, T, dilations, slope):
    PMAX = max(dilations)                               # largest "same" padding needed
    LPAD = ((PMAX + LANE - 1) // LANE) * LANE           # lane-aligned start of the centre

    def kernel(x_ref, w_ref, b_ref, o_ref, pad_ref):
        # x_ref  : (C, T)             f32   one batch element (grid axis 0 = batch)
        # w_ref  : (6, K, C, C)       bf16  per-conv, per-tap matmul weights (VMEM-resident)
        # b_ref  : (6, C, 1)          f32   biases
        # o_ref  : (C, T)             f32   output; doubles as the residual accumulator
        # pad_ref: (C, LPAD+T+PMAX)   bf16  zero-halo pre-activation buffer; the writable
        #                                   centre [LPAD, LPAD+T) is lane-aligned.

        # Zero only the halo margin strips the convs actually read (tiny stores).
        zeros = jnp.zeros((C, PMAX), jnp.bfloat16)
        pad_ref[:, LPAD - PMAX:LPAD] = zeros
        pad_ref[:, LPAD + T:LPAD + T + PMAX] = zeros

        def store_act(v):
            """Fused LeakyReLU (f32) + bf16 cast, lane-dense store into the halo centre."""
            pad_ref[:, LPAD:LPAD + T] = jnp.where(v >= 0.0, v, slope * v).astype(jnp.bfloat16)

        def conv_from_pad(ci, d):
            """Conv1d(C, C, 3, dilation=d, padding=d) on the buffered pre-activation.

            K small (C,C)@(C,T) MXU matmuls over statically-shifted bf16 slices of the
            halo buffer, f32 accumulation.  (Zero margins make the "same" padding exact
            because leaky_relu(0) == 0.)
            """
            p = d                                      # "same" padding for kernel size 3
            acc = None
            for k in range(K):
                off = LPAD - p + k * d                 # static lane offset
                t = jnp.dot(w_ref[ci, k], pad_ref[:, off:off + T],
                            preferred_element_type=jnp.float32)
                acc = t if acc is None else acc + t
            return acc + b_ref[ci]

        # ---- branch 0: read x_ref directly; o_ref is materialised at the residual add.
        store_act(x_ref[...])
        y = conv_from_pad(0, dilations[0])             # dilated conv result stays in vregs
        store_act(y)                                   # lrelu(y) straight into the halo (no xt_ref)
        o_ref[...] = x_ref[...] + conv_from_pad(1, 1)

        # ---- remaining branches accumulate into o_ref.
        for j in range(1, len(dilations)):
            cur = o_ref[...]
            store_act(cur)
            y = conv_from_pad(2 * j, dilations[j])
            store_act(y)
            o_ref[...] = cur + conv_from_pad(2 * j + 1, 1)

    return kernel, LPAD, PMAX


def residual_stack_forward(prepared, x, *, slope=LRELU_SLOPE):
    """x: (B, C, T) float32 -> (B, C, T) float32."""
    B, C, T = x.shape
    dilations = prepared["dilations"]
    n_convs = 2 * len(dilations)
    kernel, LPAD, PMAX = _make_stack_kernel(C, T, dilations, slope)

    return pl.pallas_call(
        kernel,
        out_shape=jax.ShapeDtypeStruct((B, C, T), x.dtype),
        grid_spec=pltpu.PrefetchScalarGridSpec(
            num_scalar_prefetch=0,
            grid=(B,),
            in_specs=[
                # one batch element per grid step (batch dim squeezed out of the Ref)
                pl.BlockSpec((None, C, T), lambda b: (b, 0, 0)),
                # constant index_map -> weights / biases stay VMEM-resident across the grid
                pl.BlockSpec((n_convs, K, C, C), lambda b: (0, 0, 0, 0)),
                pl.BlockSpec((n_convs, C, 1), lambda b: (0, 0, 0)),
            ],
            out_specs=pl.BlockSpec((None, C, T), lambda b: (b, 0, 0)),
            scratch_shapes=[
                pltpu.VMEM((C, LPAD + T + PMAX), jnp.bfloat16),   # zero-halo activation buffer
            ],
        ),
        compiler_params=pltpu.CompilerParams(
            dimension_semantics=("parallel",)),        # shards batch across v7x's 2 TCs
    )(x, prepared["w_stacked"], prepared["b_stacked"])


# ---------------------------------------------------------------------------
# Parameters (weight_norm is identity at init, so plain weights are exact).
# ---------------------------------------------------------------------------
def init_params(key, channels, dilations=DILATIONS, std=0.1):
    convs = []
    keys = iter(jax.random.split(key, 4 * len(dilations)))
    for d in dilations:
        for dd in (d, 1):          # (dilated conv, plain conv) per branch
            w = std * jax.random.normal(next(keys), (channels, channels, K), jnp.float32)
            b = std * jax.random.normal(next(keys), (channels,), jnp.float32)
            convs.append({"w": w, "b": b, "dilation": dd})
    return {"convs": convs, "dilations": tuple(dilations)}


def prepare_params(params):
    """One-time weight prep: (n_convs, K, C, C) bf16 per-tap matmul weights.

    NOTE: expects weight_norm-folded weights (identity at init / after
    remove_weight_norm).  For a trained checkpoint with weight_norm attached,
    fold w = g * v / ||v|| (norm over the (in, k) dims per output channel) first.
    """
    ws = [jnp.transpose(c["w"], (2, 0, 1)) for c in params["convs"]]   # (K, C_out, C_in)
    bs = [c["b"][:, None] for c in params["convs"]]
    return {
        "w_stacked": jnp.stack(ws).astype(jnp.bfloat16),   # (6, K, C, C)
        "b_stacked": jnp.stack(bs).astype(jnp.float32),    # (6, C, 1)
        "dilations": params["dilations"],
    }


# ---------------------------------------------------------------------------
# Pure-JAX reference (for correctness checking only).
# ---------------------------------------------------------------------------
def _ref_forward(params, x, slope=LRELU_SLOPE, operand_dtype=jnp.float32):
    def lrelu(v):
        return jnp.where(v >= 0.0, v, slope * v)

    def conv(v, w, b, d):
        pad = ((K - 1) * d) // 2
        v = lrelu(v).astype(operand_dtype).astype(jnp.float32)
        w = w.astype(operand_dtype).astype(jnp.float32)
        y = jax.lax.conv_general_dilated(
            v, w, window_strides=(1,), padding=[(pad, pad)],
            rhs_dilation=(d,), dimension_numbers=("NCH", "OIH", "NCH"),
            precision=jax.lax.Precision.HIGHEST)
        return y + b[None, :, None]

    convs = params["convs"]
    for j, d in enumerate(params["dilations"]):
        c1, c2 = convs[2 * j], convs[2 * j + 1]
        r = conv(x, c1["w"], c1["b"], d)
        r = conv(r, c2["w"], c2["b"], 1)
        x = x + r
    return x


# ---------------------------------------------------------------------------
if __name__ == "__main__":
    key = jax.random.PRNGKey(0)
    k_params, k_x = jax.random.split(key)

    # T chosen as a multiple of 128 -> fully lane-dense activation stores.
    B, C, T = 4, 32, 128
    params = init_params(k_params, C)
    prepared = prepare_params(params)

    x = jax.random.normal(k_x, (B, C, T), jnp.float32)

    fwd = jax.jit(functools.partial(residual_stack_forward, prepared))
    out = jax.block_until_ready(fwd(x))

    assert out.shape == (B, C, T), out.shape
    assert bool(jnp.all(jnp.isfinite(out)))

    # Tight check against a reference that rounds matmul operands (and the
    # inter-conv intermediates) to bf16 exactly like the kernel (f32 accumulation
    # in both); small slack for accumulation order / bf16 rounding boundaries.
    ref_bf16 = _ref_forward(params, x, operand_dtype=jnp.bfloat16)
    np.testing.assert_allclose(np.asarray(out), np.asarray(ref_bf16),
                               atol=5e-3, rtol=5e-3)

    # Loose semantic check against the pure-f32 reference.
    ref_f32 = _ref_forward(params, x, operand_dtype=jnp.float32)
    np.testing.assert_allclose(np.asarray(out), np.asarray(ref_f32),
                               atol=1e-1, rtol=1e-1)

    print("KERNEL_OK")
</pallas_src>

<mosaic_0001>
module attributes {stable_mosaic.version = 11 : i64} {
  func.func @kernel(%arg0: i32, %arg1: memref<1x32x128xf32, #tpu.memory_space<vmem>>, %arg2: memref<6x3x32x32xbf16, #tpu.memory_space<vmem>>, %arg3: memref<6x32x1xf32, #tpu.memory_space<vmem>>, %arg4: memref<1x32x128xf32, #tpu.memory_space<vmem>>, %arg5: memref<32x265xbf16, #tpu.memory_space<vmem>>) attributes {dimension_semantics = [#tpu.dimension_semantics<parallel>], iteration_bounds = array<i64: 4>, scalar_prefetch = 0 : i64, scratch_operands = 1 : i64, tpu.core_type = #tpu.core_type<tc>, window_params = [{transform_indices = @transform_0, window_bounds = array<i64: 1, 32, 128>}, {pipeline_mode = #tpu.pipeline_mode<synchronous>, transform_indices = @transform_1, window_bounds = array<i64: 6, 3, 32, 32>}, {pipeline_mode = #tpu.pipeline_mode<synchronous>, transform_indices = @transform_2, window_bounds = array<i64: 6, 32, 1>}, {transform_indices = @transform_3, window_bounds = array<i64: 1, 32, 128>}]} {
    %cst = arith.constant 0.000000e+00 : bf16
    %0 = vector.broadcast %cst : bf16 to vector<32x9xbf16>
    %c0 = arith.constant 0 : index
    %c119 = arith.constant 119 : index
    %1 = vector.load %arg5[%c0, %c119] : memref<32x265xbf16, #tpu.memory_space<vmem>>, vector<32x9xbf16>
    tpu.vector_store %arg5[%c0, %c119], %0 {strides = array<i32>} : memref<32x265xbf16, #tpu.memory_space<vmem>>, vector<32x9xbf16>,
    %c0_0 = arith.constant 0 : index
    %c256 = arith.constant 256 : index
    %2 = vector.load %arg5[%c0_0, %c256] : memref<32x265xbf16, #tpu.memory_space<vmem>>, vector<32x9xbf16>
    tpu.vector_store %arg5[%c0_0, %c256], %0 {strides = array<i32>} : memref<32x265xbf16, #tpu.memory_space<vmem>>, vector<32x9xbf16>,
    %c0_1 = arith.constant 0 : index
    %c0_2 = arith.constant 0 : index
    %c0_3 = arith.constant 0 : index
    %3 = vector.load %arg1[%c0_1, %c0_2, %c0_3] : memref<1x32x128xf32, #tpu.memory_space<vmem>>, vector<1x32x128xf32>
    %4 = vector.shape_cast %3 : vector<1x32x128xf32> to vector<32x128xf32>
    %cst_4 = arith.constant 0.000000e+00 : f32
    %5 = vector.broadcast %cst_4 : f32 to vector<32x128xf32>
    %6 = arith.cmpf oge, %4, %5 : vector<32x128xf32>
    %cst_5 = arith.constant 0.00999999977 : f32
    %7 = vector.broadcast %cst_5 : f32 to vector<32x128xf32>
    %8 = arith.mulf %7, %4 : vector<32x128xf32>
    %9 = arith.select %6, %4, %8 : vector<32x128xi1>, vector<32x128xf32>
    %10 = arith.truncf %9 : vector<32x128xf32> to vector<32x128xbf16>
    %c0_6 = arith.constant 0 : index
    %c128 = arith.constant 128 : index
    %11 = vector.load %arg5[%c0_6, %c128] : memref<32x265xbf16, #tpu.memory_space<vmem>>, vector<32x128xbf16>
    tpu.vector_store %arg5[%c0_6, %c128], %10 {strides = array<i32>} : memref<32x265xbf16, #tpu.memory_space<vmem>>, vector<32x128xbf16>,
    %c0_7 = arith.constant 0 : index
    %c0_8 = arith.constant 0 : index
    %c0_9 = arith.constant 0 : index
    %c0_10 = arith.constant 0 : index
    %12 = vector.load %arg2[%c0_7, %c0_8, %c0_9, %c0_10] : memref<6x3x32x32xbf16, #tpu.memory_space<vmem>>, vector<1x1x32x32xbf16>
    %13 = vector.shape_cast %12 : vector<1x1x32x32xbf16> to vector<32x32xbf16>
    %c0_11 = arith.constant 0 : index
    %c127 = arith.constant 127 : index
    %14 = vector.load %arg5[%c0_11, %c127] : memref<32x265xbf16, #tpu.memory_space<vmem>>, vector<32x128xbf16>
    %cst_12 = arith.constant dense<0.000000e+00> : vector<32x128xf32>
    %15 = tpu.matmul %13, %14, %cst_12 {dimension_numbers = #tpu.dot_dimension_numbers<[1], [0], [0], [1], [0, 0, 1, 1], [], []>} : vector<32x32xbf16>, vector<32x128xbf16>, vector<32x128xf32> -> vector<32x128xf32>
    %c0_13 = arith.constant 0 : index
    %c1 = arith.constant 1 : index
    %c0_14 = arith.constant 0 : index
    %c0_15 = arith.constant 0 : index
    %16 = vector.load %arg2[%c0_13, %c1, %c0_14, %c0_15] : memref<6x3x32x32xbf16, #tpu.memory_space<vmem>>, vector<1x1x32x32xbf16>
    %17 = vector.shape_cast %16 : vector<1x1x32x32xbf16> to vector<32x32xbf16>
    %c0_16 = arith.constant 0 : index
    %c128_17 = arith.constant 128 : index
    %18 = vector.load %arg5[%c0_16, %c128_17] : memref<32x265xbf16, #tpu.memory_space<vmem>>, vector<32x128xbf16>
    %cst_18 = arith.constant dense<0.000000e+00> : vector<32x128xf32>
    %19 = tpu.matmul %17, %18, %cst_18 {dimension_numbers = #tpu.dot_dimension_numbers<[1], [0], [0], [1], [0, 0, 1, 1], [], []>} : vector<32x32xbf16>, vector<32x128xbf16>, vector<32x128xf32> -> vector<32x128xf32>
    %20 = arith.addf %15, %19 : vector<32x128xf32>
    %c0_19 = arith.constant 0 : index
    %c2 = arith.constant 2 : index
    %c0_20 = arith.constant 0 : index
    %c0_21 = arith.constant 0 : index
    %21 = vector.load %arg2[%c0_19, %c2, %c0_20, %c0_21] : memref<6x3x32x32xbf16, #tpu.memory_space<vmem>>, vector<1x1x32x32xbf16>
    %22 = vector.shape_cast %21 : vector<1x1x32x32xbf16> to vector<32x32xbf16>
    %c0_22 = arith.constant 0 : index
    %c129 = arith.constant 129 : index
    %23 = vector.load %arg5[%c0_22, %c129] : memref<32x265xbf16, #tpu.memory_space<vmem>>, vector<32x128xbf16>
    %cst_23 = arith.constant dense<0.000000e+00> : vector<32x128xf32>
    %24 = tpu.matmul %22, %23, %cst_23 {dimension_numbers = #tpu.dot_dimension_numbers<[1], [0], [0], [1], [0, 0, 1, 1], [], []>} : vector<32x32xbf16>, vector<32x128xbf16>, vector<32x128xf32> -> vector<32x128xf32>
    %25 = arith.addf %20, %24 : vector<32x128xf32>
    %c0_24 = arith.constant 0 : index
    %c0_25 = arith.constant 0 : index
    %c0_26 = arith.constant 0 : index
    %26 = vector.load %arg3[%c0_24, %c0_25, %c0_26] : memref<6x32x1xf32, #tpu.memory_space<vmem>>, vector<1x32x1xf32>
    %27 = vector.shape_cast %26 : vector<1x32x1xf32> to vector<32x1xf32>
    %28 = vector.broadcast %27 : vector<32x1xf32> to vector<32x128xf32>
    %29 = arith.addf %25, %28 : vector<32x128xf32>
    %cst_27 = arith.constant 0.000000e+00 : f32
    %30 = vector.broadcast %cst_27 : f32 to vector<32x128xf32>
    %31 = arith.cmpf oge, %29, %30 : vector<32x128xf32>
    %cst_28 = arith.constant 0.00999999977 : f32
    %32 = vector.broadcast %cst_28 : f32 to vector<32x128xf32>
    %33 = arith.mulf %32, %29 : vector<32x128xf32>
    %34 = arith.select %31, %29, %33 : vector<32x128xi1>, vector<32x128xf32>
    %35 = arith.truncf %34 : vector<32x128xf32> to vector<32x128xbf16>
    %c0_29 = arith.constant 0 : index
    %c128_30 = arith.constant 128 : index
    %36 = vector.load %arg5[%c0_29, %c128_30] : memref<32x265xbf16, #tpu.memory_space<vmem>>, vector<32x128xbf16>
    tpu.vector_store %arg5[%c0_29, %c128_30], %35 {strides = array<i32>} : memref<32x265xbf16, #tpu.memory_space<vmem>>, vector<32x128xbf16>,
    %c0_31 = arith.constant 0 : index
    %c0_32 = arith.constant 0 : index
    %c0_33 = arith.constant 0 : index
    %37 = vector.load %arg1[%c0_31, %c0_32, %c0_33] : memref<1x32x128xf32, #tpu.memory_space<vmem>>, vector<1x32x128xf32>
    %38 = vector.shape_cast %37 : vector<1x32x128xf32> to vector<32x128xf32>
    %c1_34 = arith.constant 1 : index
    %c0_35 = arith.constant 0 : index
    %c0_36 = arith.constant 0 : index
    %c0_37 = arith.constant 0 : index
    %39 = vector.load %arg2[%c1_34, %c0_35, %c0_36, %c0_37] : memref<6x3x32x32xbf16, #tpu.memory_space<vmem>>, vector<1x1x32x32xbf16>
    %40 = vector.shape_cast %39 : vector<1x1x32x32xbf16> to vector<32x32xbf16>
    %c0_38 = arith.constant 0 : index
    %c127_39 = arith.constant 127 : index
    %41 = vector.load %arg5[%c0_38, %c127_39] : memref<32x265xbf16, #tpu.memory_space<vmem>>, vector<32x128xbf16>
    %cst_40 = arith.constant dense<0.000000e+00> : vector<32x128xf32>
    %42 = tpu.matmul %40, %41, %cst_40 {dimension_numbers = #tpu.dot_dimension_numbers<[1], [0], [0], [1], [0, 0, 1, 1], [], []>} : vector<32x32xbf16>, vector<32x128xbf16>, vector<32x128xf32> -> vector<32x128xf32>
    %c1_41 = arith.constant 1 : index
    %c1_42 = arith.constant 1 : index
    %c0_43 = arith.constant 0 : index
    %c0_44 = arith.constant 0 : index
    %43 = vector.load %arg2[%c1_41, %c1_42, %c0_43, %c0_44] : memref<6x3x32x32xbf16, #tpu.memory_space<vmem>>, vector<1x1x32x32xbf16>
    %44 = vector.shape_cast %43 : vector<1x1x32x32xbf16> to vector<32x32xbf16>
    %c0_45 = arith.constant 0 : index
    %c128_46 = arith.constant 128 : index
    %45 = vector.load %arg5[%c0_45, %c128_46] : memref<32x265xbf16, #tpu.memory_space<vmem>>, vector<32x128xbf16>
    %cst_47 = arith.constant dense<0.000000e+00> : vector<32x128xf32>
    %46 = tpu.matmul %44, %45, %cst_47 {dimension_numbers = #tpu.dot_dimension_numbers<[1], [0], [0], [1], [0, 0, 1, 1], [], []>} : vector<32x32xbf16>, vector<32x128xbf16>, vector<32x128xf32> -> vector<32x128xf32>
    %47 = arith.addf %42, %46 : vector<32x128xf32>
    %c1_48 = arith.constant 1 : index
    %c2_49 = arith.constant 2 : index
    %c0_50 = arith.constant 0 : index
    %c0_51 = arith.constant 0 : index
    %48 = vector.load %arg2[%c1_48, %c2_49, %c0_50, %c0_51] : memref<6x3x32x32xbf16, #tpu.memory_space<vmem>>, vector<1x1x32x32xbf16>
    %49 = vector.shape_cast %48 : vector<1x1x32x32xbf16> to vector<32x32xbf16>
    %c0_52 = arith.constant 0 : index
    %c129_53 = arith.constant 129 : index
    %50 = vector.load %arg5[%c0_52, %c129_53] : memref<32x265xbf16, #tpu.memory_space<vmem>>, vector<32x128xbf16>
    %cst_54 = arith.constant dense<0.000000e+00> : vector<32x128xf32>
    %51 = tpu.matmul %49, %50, %cst_54 {dimension_numbers = #tpu.dot_dimension_numbers<[1], [0], [0], [1], [0, 0, 1, 1], [], []>} : vector<32x32xbf16>, vector<32x128xbf16>, vector<32x128xf32> -> vector<32x128xf32>
    %52 = arith.addf %47, %51 : vector<32x128xf32>
    %c1_55 = arith.constant 1 : index
    %c0_56 = arith.constant 0 : index
    %c0_57 = arith.constant 0 : index
    %53 = vector.load %arg3[%c1_55, %c0_56, %c0_57] : memref<6x32x1xf32, #tpu.memory_space<vmem>>, vector<1x32x1xf32>
    %54 = vector.shape_cast %53 : vector<1x32x1xf32> to vector<32x1xf32>
    %55 = vector.broadcast %54 : vector<32x1xf32> to vector<32x128xf32>
    %56 = arith.addf %52, %55 : vector<32x128xf32>
    %57 = arith.addf %38, %56 : vector<32x128xf32>
    %c0_58 = arith.constant 0 : index
    %c0_59 = arith.constant 0 : index
    %c0_60 = arith.constant 0 : index
    %58 = vector.load %arg4[%c0_58, %c0_59, %c0_60] : memref<1x32x128xf32, #tpu.memory_space<vmem>>, vector<1x32x128xf32>
    %59 = vector.shape_cast %58 : vector<1x32x128xf32> to vector<32x128xf32>
    %60 = vector.shape_cast %57 : vector<32x128xf32> to vector<1x32x128xf32>
    tpu.vector_store %arg4[%c0_58, %c0_59, %c0_60], %60 {strides = array<i32>} : memref<1x32x128xf32, #tpu.memory_space<vmem>>, vector<1x32x128xf32>,
    %c0_61 = arith.constant 0 : index
    %c0_62 = arith.constant 0 : index
    %c0_63 = arith.constant 0 : index
    %61 = vector.load %arg4[%c0_61, %c0_62, %c0_63] : memref<1x32x128xf32, #tpu.memory_space<vmem>>, vector<1x32x128xf32>
    %62 = vector.shape_cast %61 : vector<1x32x128xf32> to vector<32x128xf32>
    %cst_64 = arith.constant 0.000000e+00 : f32
    %63 = vector.broadcast %cst_64 : f32 to vector<32x128xf32>
    %64 = arith.cmpf oge, %62, %63 : vector<32x128xf32>
    %cst_65 = arith.constant 0.00999999977 : f32
    %65 = vector.broadcast %cst_65 : f32 to vector<32x128xf32>
    %66 = arith.mulf %65, %62 : vector<32x128xf32>
    %67 = arith.select %64, %62, %66 : vector<32x128xi1>, vector<32x128xf32>
    %68 = arith.truncf %67 : vector<32x128xf32> to vector<32x128xbf16>
    %c0_66 = arith.constant 0 : index
    %c128_67 = arith.constant 128 : index
    %69 = vector.load %arg5[%c0_66, %c128_67] : memref<32x265xbf16, #tpu.memory_space<vmem>>, vector<32x128xbf16>
    tpu.vector_store %arg5[%c0_66, %c128_67], %68 {strides = array<i32>} : memref<32x265xbf16, #tpu.memory_space<vmem>>, vector<32x128xbf16>,
    %c2_68 = arith.constant 2 : index
    %c0_69 = arith.constant 0 : index
    %c0_70 = arith.constant 0 : index
    %c0_71 = arith.constant 0 : index
    %70 = vector.load %arg2[%c2_68, %c0_69, %c0_70, %c0_71] : memref<6x3x32x32xbf16, #tpu.memory_space<vmem>>, vector<1x1x32x32xbf16>
    %71 = vector.shape_cast %70 : vector<1x1x32x32xbf16> to vector<32x32xbf16>
    %c0_72 = arith.constant 0 : index
    %c125 = arith.constant 125 : index
    %72 = vector.load %arg5[%c0_72, %c125] : memref<32x265xbf16, #tpu.memory_space<vmem>>, vector<32x128xbf16>
    %cst_73 = arith.constant dense<0.000000e+00> : vector<32x128xf32>
    %73 = tpu.matmul %71, %72, %cst_73 {dimension_numbers = #tpu.dot_dimension_numbers<[1], [0], [0], [1], [0, 0, 1, 1], [], []>} : vector<32x32xbf16>, vector<32x128xbf16>, vector<32x128xf32> -> vector<32x128xf32>
    %c2_74 = arith.constant 2 : index
    %c1_75 = arith.constant 1 : index
    %c0_76 = arith.constant 0 : index
    %c0_77 = arith.constant 0 : index
    %74 = vector.load %arg2[%c2_74, %c1_75, %c0_76, %c0_77] : memref<6x3x32x32xbf16, #tpu.memory_space<vmem>>, vector<1x1x32x32xbf16>
    %75 = vector.shape_cast %74 : vector<1x1x32x32xbf16> to vector<32x32xbf16>
    %c0_78 = arith.constant 0 : index
    %c128_79 = arith.constant 128 : index
    %76 = vector.load %arg5[%c0_78, %c128_79] : memref<32x265xbf16, #tpu.memory_space<vmem>>, vector<32x128xbf16>
    %cst_80 = arith.constant dense<0.000000e+00> : vector<32x128xf32>
    %77 = tpu.matmul %75, %76, %cst_80 {dimension_numbers = #tpu.dot_dimension_numbers<[1], [0], [0], [1], [0, 0, 1, 1], [], []>} : vector<32x32xbf16>, vector<32x128xbf16>, vector<32x128xf32> -> vector<32x128xf32>
    %78 = arith.addf %73, %77 : vector<32x128xf32>
    %c2_81 = arith.constant 2 : index
    %c2_82 = arith.constant 2 : index
    %c0_83 = arith.constant 0 : index
    %c0_84 = arith.constant 0 : index
    %79 = vector.load %arg2[%c2_81, %c2_82, %c0_83, %c0_84] : memref<6x3x32x32xbf16, #tpu.memory_space<vmem>>, vector<1x1x32x32xbf16>
    %80 = vector.shape_cast %79 : vector<1x1x32x32xbf16> to vector<32x32xbf16>
    %c0_85 = arith.constant 0 : index
    %c131 = arith.constant 131 : index
    %81 = vector.load %arg5[%c0_85, %c131] : memref<32x265xbf16, #tpu.memory_space<vmem>>, vector<32x128xbf16>
    %cst_86 = arith.constant dense<0.000000e+00> : vector<32x128xf32>
    %82 = tpu.matmul %80, %81, %cst_86 {dimension_numbers = #tpu.dot_dimension_numbers<[1], [0], [0], [1], [0, 0, 1, 1], [], []>} : vector<32x32xbf16>, vector<32x128xbf16>, vector<32x128xf32> -> vector<32x128xf32>
    %83 = arith.addf %78, %82 : vector<32x128xf32>
    %c2_87 = arith.constant 2 : index
    %c0_88 = arith.constant 0 : index
    %c0_89 = arith.constant 0 : index
    %84 = vector.load %arg3[%c2_87, %c0_88, %c0_89] : memref<6x32x1xf32, #tpu.memory_space<vmem>>, vector<1x32x1xf32>
    %85 = vector.shape_cast %84 : vector<1x32x1xf32> to vector<32x1xf32>
    %86 = vector.broadcast %85 : vector<32x1xf32> to vector<32x128xf32>
    %87 = arith.addf %83, %86 : vector<32x128xf32>
    %cst_90 = arith.constant 0.000000e+00 : f32
    %88 = vector.broadcast %cst_90 : f32 to vector<32x128xf32>
    %89 = arith.cmpf oge, %87, %88 : vector<32x128xf32>
    %cst_91 = arith.constant 0.00999999977 : f32
    %90 = vector.broadcast %cst_91 : f32 to vector<32x128xf32>
    %91 = arith.mulf %90, %87 : vector<32x128xf32>
    %92 = arith.select %89, %87, %91 : vector<32x128xi1>, vector<32x128xf32>
    %93 = arith.truncf %92 : vector<32x128xf32> to vector<32x128xbf16>
    %c0_92 = arith.constant 0 : index
    %c128_93 = arith.constant 128 : index
    %94 = vector.load %arg5[%c0_92, %c128_93] : memref<32x265xbf16, #tpu.memory_space<vmem>>, vector<32x128xbf16>
    tpu.vector_store %arg5[%c0_92, %c128_93], %93 {strides = array<i32>} : memref<32x265xbf16, #tpu.memory_space<vmem>>, vector<32x128xbf16>,
    %c3 = arith.constant 3 : index
    %c0_94 = arith.constant 0 : index
    %c0_95 = arith.constant 0 : index
    %c0_96 = arith.constant 0 : index
    %95 = vector.load %arg2[%c3, %c0_94, %c0_95, %c0_96] : memref<6x3x32x32xbf16, #tpu.memory_space<vmem>>, vector<1x1x32x32xbf16>
    %96 = vector.shape_cast %95 : vector<1x1x32x32xbf16> to vector<32x32xbf16>
    %c0_97 = arith.constant 0 : index
    %c127_98 = arith.constant 127 : index
    %97 = vector.load %arg5[%c0_97, %c127_98] : memref<32x265xbf16, #tpu.memory_space<vmem>>, vector<32x128xbf16>
    %cst_99 = arith.constant dense<0.000000e+00> : vector<32x128xf32>
    %98 = tpu.matmul %96, %97, %cst_99 {dimension_numbers = #tpu.dot_dimension_numbers<[1], [0], [0], [1], [0, 0, 1, 1], [], []>} : vector<32x32xbf16>, vector<32x128xbf16>, vector<32x128xf32> -> vector<32x128xf32>
    %c3_100 = arith.constant 3 : index
    %c1_101 = arith.constant 1 : index
    %c0_102 = arith.constant 0 : index
    %c0_103 = arith.constant 0 : index
    %99 = vector.load %arg2[%c3_100, %c1_101, %c0_102, %c0_103] : memref<6x3x32x32xbf16, #tpu.memory_space<vmem>>, vector<1x1x32x32xbf16>
    %100 = vector.shape_cast %99 : vector<1x1x32x32xbf16> to vector<32x32xbf16>
    %c0_104 = arith.constant 0 : index
    %c128_105 = arith.constant 128 : index
    %101 = vector.load %arg5[%c0_104, %c128_105] : memref<32x265xbf16, #tpu.memory_space<vmem>>, vector<32x128xbf16>
    %cst_106 = arith.constant dense<0.000000e+00> : vector<32x128xf32>
    %102 = tpu.matmul %100, %101, %cst_106 {dimension_numbers = #tpu.dot_dimension_numbers<[1], [0], [0], [1], [0, 0, 1, 1], [], []>} : vector<32x32xbf16>, vector<32x128xbf16>, vector<32x128xf32> -> vector<32x128xf32>
    %103 = arith.addf %98, %102 : vector<32x128xf32>
    %c3_107 = arith.constant 3 : index
    %c2_108 = arith.constant 2 : index
    %c0_109 = arith.constant 0 : index
    %c0_110 = arith.constant 0 : index
    %104 = vector.load %arg2[%c3_107, %c2_108, %c0_109, %c0_110] : memref<6x3x32x32xbf16, #tpu.memory_space<vmem>>, vector<1x1x32x32xbf16>
    %105 = vector.shape_cast %104 : vector<1x1x32x32xbf16> to vector<32x32xbf16>
    %c0_111 = arith.constant 0 : index
    %c129_112 = arith.constant 129 : index
    %106 = vector.load %arg5[%c0_111, %c129_112] : memref<32x265xbf16, #tpu.memory_space<vmem>>, vector<32x128xbf16>
    %cst_113 = arith.constant dense<0.000000e+00> : vector<32x128xf32>
    %107 = tpu.matmul %105, %106, %cst_113 {dimension_numbers = #tpu.dot_dimension_numbers<[1], [0], [0], [1], [0, 0, 1, 1], [], []>} : vector<32x32xbf16>, vector<32x128xbf16>, vector<32x128xf32> -> vector<32x128xf32>
    %108 = arith.addf %103, %107 : vector<32x128xf32>
    %c3_114 = arith.constant 3 : index
    %c0_115 = arith.constant 0 : index
    %c0_116 = arith.constant 0 : index
    %109 = vector.load %arg3[%c3_114, %c0_115, %c0_116] : memref<6x32x1xf32, #tpu.memory_space<vmem>>, vector<1x32x1xf32>
    %110 = vector.shape_cast %109 : vector<1x32x1xf32> to vector<32x1xf32>
    %111 = vector.broadcast %110 : vector<32x1xf32> to vector<32x128xf32>
    %112 = arith.addf %108, %111 : vector<32x128xf32>
    %113 = arith.addf %62, %112 : vector<32x128xf32>
    %c0_117 = arith.constant 0 : index
    %c0_118 = arith.constant 0 : index
    %c0_119 = arith.constant 0 : index
    %114 = vector.load %arg4[%c0_117, %c0_118, %c0_119] : memref<1x32x128xf32, #tpu.memory_space<vmem>>, vector<1x32x128xf32>
    %115 = vector.shape_cast %114 : vector<1x32x128xf32> to vector<32x128xf32>
    %116 = vector.shape_cast %113 : vector<32x128xf32> to vector<1x32x128xf32>
    tpu.vector_store %arg4[%c0_117, %c0_118, %c0_119], %116 {strides = array<i32>} : memref<1x32x128xf32, #tpu.memory_space<vmem>>, vector<1x32x128xf32>,
    %c0_120 = arith.constant 0 : index
    %c0_121 = arith.constant 0 : index
    %c0_122 = arith.constant 0 : index
    %117 = vector.load %arg4[%c0_120, %c0_121, %c0_122] : memref<1x32x128xf32, #tpu.memory_space<vmem>>, vector<1x32x128xf32>
    %118 = vector.shape_cast %117 : vector<1x32x128xf32> to vector<32x128xf32>
    %cst_123 = arith.constant 0.000000e+00 : f32
    %119 = vector.broadcast %cst_123 : f32 to vector<32x128xf32>
    %120 = arith.cmpf oge, %118, %119 : vector<32x128xf32>
    %cst_124 = arith.constant 0.00999999977 : f32
    %121 = vector.broadcast %cst_124 : f32 to vector<32x128xf32>
    %122 = arith.mulf %121, %118 : vector<32x128xf32>
    %123 = arith.select %120, %118, %122 : vector<32x128xi1>, vector<32x128xf32>
    %124 = arith.truncf %123 : vector<32x128xf32> to vector<32x128xbf16>
    %c0_125 = arith.constant 0 : index
    %c128_126 = arith.constant 128 : index
    %125 = vector.load %arg5[%c0_125, %c128_126] : memref<32x265xbf16, #tpu.memory_space<vmem>>, vector<32x128xbf16>
    tpu.vector_store %arg5[%c0_125, %c128_126], %124 {strides = array<i32>} : memref<32x265xbf16, #tpu.memory_space<vmem>>, vector<32x128xbf16>,
    %c4 = arith.constant 4 : index
    %c0_127 = arith.constant 0 : index
    %c0_128 = arith.constant 0 : index
    %c0_129 = arith.constant 0 : index
    %126 = vector.load %arg2[%c4, %c0_127, %c0_128, %c0_129] : memref<6x3x32x32xbf16, #tpu.memory_space<vmem>>, vector<1x1x32x32xbf16>
    %127 = vector.shape_cast %126 : vector<1x1x32x32xbf16> to vector<32x32xbf16>
    %c0_130 = arith.constant 0 : index
    %c119_131 = arith.constant 119 : index
    %128 = vector.load %arg5[%c0_130, %c119_131] : memref<32x265xbf16, #tpu.memory_space<vmem>>, vector<32x128xbf16>
    %cst_132 = arith.constant dense<0.000000e+00> : vector<32x128xf32>
    %129 = tpu.matmul %127, %128, %cst_132 {dimension_numbers = #tpu.dot_dimension_numbers<[1], [0], [0], [1], [0, 0, 1, 1], [], []>} : vector<32x32xbf16>, vector<32x128xbf16>, vector<32x128xf32> -> vector<32x128xf32>
    %c4_133 = arith.constant 4 : index
    %c1_134 = arith.constant 1 : index
    %c0_135 = arith.constant 0 : index
    %c0_136 = arith.constant 0 : index
    %130 = vector.load %arg2[%c4_133, %c1_134, %c0_135, %c0_136] : memref<6x3x32x32xbf16, #tpu.memory_space<vmem>>, vector<1x1x32x32xbf16>
    %131 = vector.shape_cast %130 : vector<1x1x32x32xbf16> to vector<32x32xbf16>
    %c0_137 = arith.constant 0 : index
    %c128_138 = arith.constant 128 : index
    %132 = vector.load %arg5[%c0_137, %c128_138] : memref<32x265xbf16, #tpu.memory_space<vmem>>, vector<32x128xbf16>
    %cst_139 = arith.constant dense<0.000000e+00> : vector<32x128xf32>
    %133 = tpu.matmul %131, %132, %cst_139 {dimension_numbers = #tpu.dot_dimension_numbers<[1], [0], [0], [1], [0, 0, 1, 1], [], []>} : vector<32x32xbf16>, vector<32x128xbf16>, vector<32x128xf32> -> vector<32x128xf32>
    %134 = arith.addf %129, %133 : vector<32x128xf32>
    %c4_140 = arith.constant 4 : index
    %c2_141 = arith.constant 2 : index
    %c0_142 = arith.constant 0 : index
    %c0_143 = arith.constant 0 : index
    %135 = vector.load %arg2[%c4_140, %c2_141, %c0_142, %c0_143] : memref<6x3x32x32xbf16, #tpu.memory_space<vmem>>, vector<1x1x32x32xbf16>
    %136 = vector.shape_cast %135 : vector<1x1x32x32xbf16> to vector<32x32xbf16>
    %c0_144 = arith.constant 0 : index
    %c137 = arith.constant 137 : index
    %137 = vector.load %arg5[%c0_144, %c137] : memref<32x265xbf16, #tpu.memory_space<vmem>>, vector<32x128xbf16>
    %cst_145 = arith.constant dense<0.000000e+00> : vector<32x128xf32>
    %138 = tpu.matmul %136, %137, %cst_145 {dimension_numbers = #tpu.dot_dimension_numbers<[1], [0], [0], [1], [0, 0, 1, 1], [], []>} : vector<32x32xbf16>, vector<32x128xbf16>, vector<32x128xf32> -> vector<32x128xf32>
    %139 = arith.addf %134, %138 : vector<32x128xf32>
    %c4_146 = arith.constant 4 : index
    %c0_147 = arith.constant 0 : index
    %c0_148 = arith.constant 0 : index
    %140 = vector.load %arg3[%c4_146, %c0_147, %c0_148] : memref<6x32x1xf32, #tpu.memory_space<vmem>>, vector<1x32x1xf32>
    %141 = vector.shape_cast %140 : vector<1x32x1xf32> to vector<32x1xf32>
    %142 = vector.broadcast %141 : vector<32x1xf32> to vector<32x128xf32>
    %143 = arith.addf %139, %142 : vector<32x128xf32>
    %cst_149 = arith.constant 0.000000e+00 : f32
    %144 = vector.broadcast %cst_149 : f32 to vector<32x128xf32>
    %145 = arith.cmpf oge, %143, %144 : vector<32x128xf32>
    %cst_150 = arith.constant 0.00999999977 : f32
    %146 = vector.broadcast %cst_150 : f32 to vector<32x128xf32>
    %147 = arith.mulf %146, %143 : vector<32x128xf32>
    %148 = arith.select %145, %143, %147 : vector<32x128xi1>, vector<32x128xf32>
    %149 = arith.truncf %148 : vector<32x128xf32> to vector<32x128xbf16>
    %c0_151 = arith.constant 0 : index
    %c128_152 = arith.constant 128 : index
    %150 = vector.load %arg5[%c0_151, %c128_152] : memref<32x265xbf16, #tpu.memory_space<vmem>>, vector<32x128xbf16>
    tpu.vector_store %arg5[%c0_151, %c128_152], %149 {strides = array<i32>} : memref<32x265xbf16, #tpu.memory_space<vmem>>, vector<32x128xbf16>,
    %c5 = arith.constant 5 : index
    %c0_153 = arith.constant 0 : index
    %c0_154 = arith.constant 0 : index
    %c0_155 = arith.constant 0 : index
    %151 = vector.load %arg2[%c5, %c0_153, %c0_154, %c0_155] : memref<6x3x32x32xbf16, #tpu.memory_space<vmem>>, vector<1x1x32x32xbf16>
    %152 = vector.shape_cast %151 : vector<1x1x32x32xbf16> to vector<32x32xbf16>
    %c0_156 = arith.constant 0 : index
    %c127_157 = arith.constant 127 : index
    %153 = vector.load %arg5[%c0_156, %c127_157] : memref<32x265xbf16, #tpu.memory_space<vmem>>, vector<32x128xbf16>
    %cst_158 = arith.constant dense<0.000000e+00> : vector<32x128xf32>
    %154 = tpu.matmul %152, %153, %cst_158 {dimension_numbers = #tpu.dot_dimension_numbers<[1], [0], [0], [1], [0, 0, 1, 1], [], []>} : vector<32x32xbf16>, vector<32x128xbf16>, vector<32x128xf32> -> vector<32x128xf32>
    %c5_159 = arith.constant 5 : index
    %c1_160 = arith.constant 1 : index
    %c0_161 = arith.constant 0 : index
    %c0_162 = arith.constant 0 : index
    %155 = vector.load %arg2[%c5_159, %c1_160, %c0_161, %c0_162] : memref<6x3x32x32xbf16, #tpu.memory_space<vmem>>, vector<1x1x32x32xbf16>
    %156 = vector.shape_cast %155 : vector<1x1x32x32xbf16> to vector<32x32xbf16>
    %c0_163 = arith.constant 0 : index
    %c128_164 = arith.constant 128 : index
    %157 = vector.load %arg5[%c0_163, %c128_164] : memref<32x265xbf16, #tpu.memory_space<vmem>>, vector<32x128xbf16>
    %cst_165 = arith.constant dense<0.000000e+00> : vector<32x128xf32>
    %158 = tpu.matmul %156, %157, %cst_165 {dimension_numbers = #tpu.dot_dimension_numbers<[1], [0], [0], [1], [0, 0, 1, 1], [], []>} : vector<32x32xbf16>, vector<32x128xbf16>, vector<32x128xf32> -> vector<32x128xf32>
    %159 = arith.addf %154, %158 : vector<32x128xf32>
    %c5_166 = arith.constant 5 : index
    %c2_167 = arith.constant 2 : index
    %c0_168 = arith.constant 0 : index
    %c0_169 = arith.constant 0 : index
    %160 = vector.load %arg2[%c5_166, %c2_167, %c0_168, %c0_169] : memref<6x3x32x32xbf16, #tpu.memory_space<vmem>>, vector<1x1x32x32xbf16>
    %161 = vector.shape_cast %160 : vector<1x1x32x32xbf16> to vector<32x32xbf16>
    %c0_170 = arith.constant 0 : index
    %c129_171 = arith.constant 129 : index
    %162 = vector.load %arg5[%c0_170, %c129_171] : memref<32x265xbf16, #tpu.memory_space<vmem>>, vector<32x128xbf16>
    %cst_172 = arith.constant dense<0.000000e+00> : vector<32x128xf32>
    %163 = tpu.matmul %161, %162, %cst_172 {dimension_numbers = #tpu.dot_dimension_numbers<[1], [0], [0], [1], [0, 0, 1, 1], [], []>} : vector<32x32xbf16>, vector<32x128xbf16>, vector<32x128xf32> -> vector<32x128xf32>
    %164 = arith.addf %159, %163 : vector<32x128xf32>
    %c5_173 = arith.constant 5 : index
    %c0_174 = arith.constant 0 : index
    %c0_175 = arith.constant 0 : index
    %165 = vector.load %arg3[%c5_173, %c0_174, %c0_175] : memref<6x32x1xf32, #tpu.memory_space<vmem>>, vector<1x32x1xf32>
    %166 = vector.shape_cast %165 : vector<1x32x1xf32> to vector<32x1xf32>
    %167 = vector.broadcast %166 : vector<32x1xf32> to vector<32x128xf32>
    %168 = arith.addf %164, %167 : vector<32x128xf32>
    %169 = arith.addf %118, %168 : vector<32x128xf32>
    %c0_176 = arith.constant 0 : index
    %c0_177 = arith.constant 0 : index
    %c0_178 = arith.constant 0 : index
    %170 = vector.load %arg4[%c0_176, %c0_177, %c0_178] : memref<1x32x128xf32, #tpu.memory_space<vmem>>, vector<1x32x128xf32>
    %171 = vector.shape_cast %170 : vector<1x32x128xf32> to vector<32x128xf32>
    %172 = vector.shape_cast %169 : vector<32x128xf32> to vector<1x32x128xf32>
    tpu.vector_store %arg4[%c0_176, %c0_177, %c0_178], %172 {strides = array<i32>} : memref<1x32x128xf32, #tpu.memory_space<vmem>>, vector<1x32x128xf32>,
    return
  }
  func.func @transform_0(%arg0: i32) -> (i32, i32, i32) {
    %c0_i32 = arith.constant 0 : i32
    %c0_i32_0 = arith.constant 0 : i32
    %c0_i32_1 = arith.constant 0 : i32
    return %arg0, %c0_i32, %c0_i32_0 : i32, i32, i32
  }
  func.func @transform_1(%arg0: i32) -> (i32, i32, i32, i32) {
    %c0_i32 = arith.constant 0 : i32
    %c0_i32_0 = arith.constant 0 : i32
    %c0_i32_1 = arith.constant 0 : i32
    %c0_i32_2 = arith.constant 0 : i32
    %c0_i32_3 = arith.constant 0 : i32
    return %c0_i32, %c0_i32_0, %c0_i32_1, %c0_i32_2 : i32, i32, i32, i32
  }
  func.func @transform_2(%arg0: i32) -> (i32, i32, i32) {
    %c0_i32 = arith.constant 0 : i32
    %c0_i32_0 = arith.constant 0 : i32
    %c0_i32_1 = arith.constant 0 : i32
    %c0_i32_2 = arith.constant 0 : i32
    return %c0_i32, %c0_i32_0, %c0_i32_1 : i32, i32, i32
  }
  func.func @transform_3(%arg0: i32) -> (i32, i32, i32) {
    %c0_i32 = arith.constant 0 : i32
    %c0_i32_0 = arith.constant 0 : i32
    %c0_i32_1 = arith.constant 0 : i32
    return %arg0, %c0_i32, %c0_i32_0 : i32, i32, i32
  }
}

</mosaic_0001>

<bundles_post_ra>
// kernel: residual_stack_forward.1
= control target key start
LH: loop header
LB: loop body
LE: loop exit
PB: predicated region body
PF: predicated region fallthrough
CT: control target
= control target key end

     0   :  { %8 = vsyncpa [#allocation4], 0  ;;  %s3665_s0 = inlined_call_operand.hbm [shape: f32[4,32,128], index: 0, kind: input, shape index: {}]   ;;  %s3666_s1 = inlined_call_operand.hbm [shape: bf16[6,3,32,32], index: 1, kind: input, shape index: {}]   ;;  %s3667_s2 = inlined_call_operand.hbm [shape: f32[6,32,1], index: 2, kind: input, shape index: {}]   ;;  %s3668_s3 = inlined_call_operand.hbm [shape: f32[4,32,128], index: 3, kind: output, shape index: {}]  }
   0x1   :  { %10 = vsyncpa [#allocation4 + $0x1], 0 }
   0x2   :  { %11 = vsyncpa [#allocation7], 0 }
   0x3   :  { %12 = vsyncpa [#allocation5], 0 }
   0x4   :  { %14 = vsyncpa [#allocation5 + $0x1], 0  ;;  %s3313_s12 = smov 0   ;;  %s3315_s13 = smov 0  }
   0x5   :  { %s3317_s14 = smov 0   ;;  %s3319_s15 = smov 0  }
   0x6 LB: > { %s3334_s16 = sadd.s32 4294967295, %s3274_s15   ;;  %s2510_s17 = sadd.s32 4294967294, %s3274_s15   ;;  %s3274_s15 = sphi %s3319_s15, %s3689_s15   ;;  %s3270_s14 = sphi %s3317_s14, %s3688_s14   ;;  %s3266_s13 = sphi %s3315_s13, %s3687_s13   ;;  %s3262_s12 = sphi %s3313_s12, %s3686_s12  }
   0x7   : > { %p40_p0 = scmp.ne.s32.totalorder %s3266_s13, %s3262_s12  ;;  %p3669_p1 = scmp.eq.s32.totalorder %s3334_s16, 0 }
   0x8   : > { %p112_p3 = scmp.eq.s32.totalorder %s2510_s17, 3  ;;  %p2511_p5 = scmp.ge.s32.totalorder %s3274_s15, 1 }
   0x9   : > { %p3343_p4 = por %p3669_p1, %p40_p0  ;;  %p119_p7 = scmp.lt.s32.totalorder %s3274_s15, 5 }
   0xa   : > { %p3348_p6 = por %p112_p3, %p40_p0  ;;  %s3276_s21 = smov [#allocation6]  }
   0xb   : > { %s3673_s18 = scalar_select %p3343_p4, 1, 0 }
   0xc   : > { %s3674_s19 = scalar_select %p3348_p6, 1, 0 }
   0xd   : > { %p3353_p8 = pnand %p2511_p5, %p119_p7  ;;  %s131_s22 = sshll.u32 %s3276_s21, 4  ;;  %s132_s22 = int_to_ptr.vmem [resolvable:$true] %s131_s22 }
   0xe   : > { %s3277_s24 = smov [#allocation8]   ;;  %s3137_s26 = scalar_lea.vmem %s132_s22, 4608 }
   0xf   : > { %s3675_s20 = scalar_select %p3353_p8, 1, 0 }
  0x10   : > { %p2938_p9 = pneg %p3353_p8  ;;  %s144_s25 = sshll.u32 %s3277_s24, 4  ;;  %s145_s25 = int_to_ptr.vmem [resolvable:$true] %s144_s25 }
  0x11   : > { %p3138_p12 = scmp.ne.s32.totalorder %s132_s22, %s3137_s26  ;;  %p3145_p3 = scmp.lt.s32.totalorder %s132_s22, %s132_s22 }
  0x12   : > { %p3361_p10 = pnand %p2938_p9, %p3669_p1  ;;  %p3146_p5 = scmp.lt.s32.totalorder %s3137_s26, %s3137_s26 }
  0x14   : > { %p3128_p11 = pneg %p3361_p10  ;;  %p3147_p7 = por %p3146_p5, %p3145_p3 }
  0x16   : > { %p3140_p13 = pnand %p3138_p12, %p3128_p11 }
  0x18   : > { %p3141_p0 = pneg %p3140_p13 }
  0x1a   : > { %p3148_p9 = pnand %p3147_p7, %p3141_p0 }
  0x1c   : > { %3151 = shalt.err (!%p3148_p9)
}
  0x1d   : > { %s3278_s27 = smov 64   ;;  %s3279_s28 = smov 4  }
  0x1e   : > { %2941 = dma.hbm_to_vmem [thread:$0]  (!%p3361_p10), %s3666_s1, 4608, %s132_s22, [#allocation7], %s3278_s27, %s3278_s27, %s3279_s28  }
  0x1f   : > { %s3163_s4 = scalar_lea.vmem %s145_s25, 3072  ;;  %p3171_p2 = scmp.lt.s32.totalorder %s145_s25, %s145_s25 }
  0x20   : > { %p3164_p1 = scmp.ne.s32.totalorder %s145_s25, %s3163_s4  ;;  %p3172_p6 = scmp.lt.s32.totalorder %s3163_s4, %s3163_s4 }
  0x22   : > { %p3166_p12 = pnand %p3164_p1, %p3128_p11  ;;  %p3173_p3 = por %p3172_p6, %p3171_p2 }
  0x24   : > { %p3167_p13 = pneg %p3166_p12 }
  0x26   : > { %p3174_p0 = pnand %p3173_p3, %p3167_p13 }
  0x28   : > { %3177 = shalt.err (!%p3174_p0)
}
  0x29   : > { %s3280_s5 = smov 128   ;;  %s3281_s6 = smov 8  }
  0x2a   : > { %2944 = dma.hbm_to_vmem [thread:$0]  (!%p3361_p10), %s3667_s2, 3072, %s145_s25, [#allocation7], %s3280_s5, %s3280_s5, %s3281_s6  }
  0x2b   : > { %s3387_s9 = sadd.s32 1, %s3274_s15   ;;  %s27_s11 = sadd.s32 1, %s3270_s14 }
  0x2c   : > { %s24_s10 = ssub.s32 %s3274_s15, %s3387_s9  ;;  %p34_p2 = scmp.ne.s32.totalorder %s3270_s14, %s3266_s13 }
  0x2d   : > { %p25_p1 = scmp.eq.s32.totalorder %s24_s10, 0  ;;  %p35_p6 = scmp.eq.s32.totalorder %s3274_s15, 0 }
  0x2e   : > { %p3677_p5 = scmp.eq.s32.totalorder %s3334_s16, 3  ;;  %p2955_p9 = scmp.lt.s32.totalorder %s3274_s15, 4 }
  0x2f   : > { %s3396_s17 = scalar_select %p25_p1, %s3270_s14, %s27_s11  }
  0x30   : > { %p36_p11 = por %p35_p6, %p34_p2  ;;  %p3400_p7 = por %p3677_p5, %p34_p2 }
  0x31   : > { %s158_s22 = sand.u32 1, %s3270_s14   ;;  %s2684_s24 = sshll.u32 %s3274_s15, 9 }
  0x32   : > { %s3678_s21 = scalar_select %p3400_p7, 1, 0 }
  0x33   : > { %s2515_s23 = sshll.u32 %s158_s22, 5  ;;  %s3410_s27 = scalar_lea.hbm %s3665_s0, %s2684_s24 }
  0x34   : > { %s162_s28 = scalar_lea.vmem [#allocation3], %s2515_s23  ;;  %p3414_p10 = pnand %p2955_p9, %p36_p11 }
  0x35   : > { %s169_s29 = sshll.u32 %s162_s28, 4  ;;  %s3418_s4 = scalar_lea.sflag [#allocation4], %s158_s22  ;;  %s3412_s29 = int_to_ptr.vmem [resolvable:$true] %s169_s29 }
  0x36   : > { %s3178_s7 = scalar_lea.hbm %s3410_s27, 512  ;;  %p3180_p13 = pneg %p3414_p10 }
  0x37   : > { %p3179_p12 = scmp.ne.s32.totalorder %s3410_s27, %s3178_s7  ;;  %s3183_s11 = scalar_lea.hbm %s3665_s0, 2048 }
  0x38   : > { %p3184_p1 = scmp.lt.s32.totalorder %s3410_s27, %s3665_s0  ;;  %p3185_p2 = scmp.lt.s32.totalorder %s3183_s11, %s3178_s7 }
  0x39   : > { %p3181_p3 = pnand %p3180_p13, %p3179_p12 }
  0x3a   : > { %p3186_p6 = por %p3185_p2, %p3184_p1 }
  0x3b   : > { %p3182_p0 = pneg %p3181_p3 }
  0x3d   : > { %p3187_p11 = pnand %p3186_p6, %p3182_p0 }
  0x3f   : > { %3190 = shalt.err (!%p3187_p11)
}
  0x40   : > { %s3191_s22 = scalar_lea.vmem %s3412_s29, 512  ;;  %s3282_s25 = smov [#allocation3]  }
  0x41   : > { %p3192_p5 = scmp.ne.s32.totalorder %s3412_s29, %s3191_s22  ;;  %s3196_s26 = sshll.u32 %s3282_s25, 4  ;;  %s3197_s26 = int_to_ptr.vmem [resolvable:$false] %s3196_s26 }
  0x42   : > { %s3198_s28 = scalar_lea.vmem %s3197_s26, 1024  ;;  %p3199_p3 = scmp.lt.s32.totalorder %s3412_s29, %s3197_s26 }
  0x43   : > { %p3194_p9 = pnand %p3192_p5, %p3180_p13  ;;  %p3200_p7 = scmp.lt.s32.totalorder %s3198_s28, %s3191_s22 }
  0x45   : > { %p3195_p12 = pneg %p3194_p9  ;;  %p3201_p4 = por %p3200_p7, %p3199_p3 }
  0x47   : > { %p3202_p8 = pnand %p3201_p4, %p3195_p12 }
  0x49   : > { %3205 = shalt.err (!%p3202_p8)
}
  0x4a   : > { %2948 = dma.hbm_to_vmem [thread:$0]  (!%p3414_p10), %s3410_s27, 512, %s3412_s29, %s3418_s4, %s3280_s5, %s3280_s5, %s3281_s6  }
  0x4b   : > { %p3680_p13 = scmp.ne.s32.totalorder %s3675_s20, 0 }
  0x4c   : > { %s3445_s7 = sand.u32 (!%p3680_p13), 1, %s3266_s13   ;;  %p3681_p4 = scmp.ne.s32.totalorder (!%p3680_p13), %s3673_s18, 0 }
  0x4d   : > { %181 = sbr.rel (%p3680_p13) target bundleno = 2193 (0x891), region = 32  ;;  %s2519_s8 = sshll.u32 (!%p3680_p13), %s3445_s7, 5 }
  0x4e   : > { %s184_s10 = scalar_lea.sflag (!%p3680_p13), [#allocation4], %s3445_s7  ;;  %s187_s30 = scalar_lea.vmem (!%p3680_p13), [#allocation3], %s2519_s8 }
  0x52   : > { %3249 = dma.done.wait (%p3681_p4), %s184_s10, 512  }
  0x53   : > { %3251 = vsyncadd (%p3681_p4), %s184_s10, 4294966784  ;;  %p3682_p8 = scmp.eq.s32.totalorder %s3334_s16, 0 }
  0x55   : > { %3253 = dma.done.wait (%p3682_p8), [#allocation7], 7680   ;;  %p3683_p7 = pmov %p3682_p8 }
  0x56   : > { %vm224_vm0 = vcmask 68608   ;;  %vm219_vm1 = vcmask 1044408   ;;  %v3283_v0 = vmov 0   ;;  %v3459_v1 = vld [vmem:[%s187_s30 + $0x10] sm:$0xff]  ;;  %v3461_v2 = vld [vmem:[%s187_s30 + $0x18] sm:$0xff]  ;;  %v3463_v3 = vld [vmem:[%s187_s30] sm:$0xff] }
  0x57   : > { %3255 = vsyncadd (%p3683_p7), [#allocation7], 4294959616  ;;  %227 = vst.msk [vmem:[#allocation2 + $0x20] sm:$0xf] %vm224_vm0, %v3283_v0  ;;  %3007 = vset.pattern.permute.xlu1 %v3283_v0  ;;  %3006 = vset.pattern.permute.xlu0 %v3283_v0  ;;  %vm235_vm2 = vcmp.ge.f32.partialorder %v3459_v1, 0.0  ;;  %vm236_vm3 = vcmp.ge.f32.partialorder %v3461_v2, 0.0 }
  0x58   : > { %228 = vst.msk [vmem:[#allocation2 + $0x2c] sm:$0xf] %vm224_vm0, %v3283_v0  ;;  %225 = vst.msk [vmem:[#allocation2 + $0x8] sm:$0xf] %vm224_vm0, %v3283_v0  ;;  %v239_v4 = vmul.f32 0.01, %v3459_v1 }
  0x59   : > { %226 = vst.msk [vmem:[#allocation2 + $0x14] sm:$0xf] %vm224_vm0, %v3283_v0  ;;  %v240_v5 = vmul.f32 0.01, %v3461_v2  ;;  %v3469_v6 = vld [vmem:[%s187_s30 + $0x8] sm:$0xff]  ;;  %vm233_vm4 = vcmp.ge.f32.partialorder %v3463_v3, 0.0 }
  0x5a   : > { %222 = vst.msk [vmem:[#allocation2 + $0x18] sm:$0xf] %vm219_vm1, %v3283_v0  ;;  %223 = vst.msk [vmem:[#allocation2 + $0x24] sm:$0xf] %vm219_vm1, %v3283_v0  ;;  %v237_v7 = vmul.f32 0.01, %v3463_v3  ;;  %v243_v8 = vsel %vm235_vm2, %v3459_v1, %v239_v4 }
  0x5b   : > { %220 = vst.msk [vmem:[#allocation2] sm:$0xf] %vm219_vm1, %v3283_v0  ;;  %221 = vst.msk [vmem:[#allocation2 + $0xc] sm:$0xf] %vm219_vm1, %v3283_v0  ;;  %v244_v9 = vsel %vm236_vm3, %v3461_v2, %v240_v5  ;;  %vm234_vm5 = vcmp.ge.f32.partialorder %v3469_v6, 0.0  ;;  %v3020_v11 = vld [vmem:[#allocation6 + $0x10] sm:$0xff]   ;;  %v2687_v12 = vpack.c.bf16 %v243_v8, %v243_v8 }
  0x5c   : > { %v238_v10 = vmul.f32 0.01, %v3469_v6  ;;  %v2688_v13 = vpack.c.bf16 %v244_v9, %v244_v9  ;;  %v241_v14 = vsel %vm233_vm4, %v3463_v3, %v237_v7  ;;  %vm304_vm6 = vcmask 261120   ;;  %s3284_s18 = smov 127   ;;  %s3285_s20 = smov 1   ;;  %v3022_v29 = vld [vmem:[#allocation6] sm:$0xff]  }
  0x5d   : > { %v2685_v16 = vpack.c.bf16 %v241_v14, %v241_v14  ;;  %2786 = vmatprep.mubr.msk.bf16.mxu0 %vm304_vm6, %v3020_v11  ;;  %263 = vst [vmem:[#allocation2 + $0x1c] sm:$0xf] %v2687_v12  ;;  %2794 = vmatprep.mubr.msk.bf16.mxu1 %vm304_vm6, %v3022_v29  ;;  %v3021_v33 = vld [vmem:[#allocation6 + $0x18] sm:$0xff]   ;;  %v3024_v34 = vld [vmem:[#allocation6 + $0x20] sm:$0xff]   ;;  %v563_v36 = vld [vmem:[#allocation8 + $0x10] sm:$0xff]  ;;  %vm497_vm7 = vcmask 1039360  }
  0x5e   : > { %v242_v15 = vsel %vm234_vm5, %v3469_v6, %v238_v10  ;;  %264 = vst [vmem:[#allocation2 + $0x28] sm:$0xf] %v2688_v13  ;;  %v564_v35 = vld [vmem:[#allocation8 + $0x18] sm:$0xff]  ;;  %v561_v37 = vld [vmem:[#allocation8] sm:$0xff]  ;;  %v562_v38 = vld [vmem:[#allocation8 + $0x8] sm:$0xff]  ;;  %vm394_vm8 = vcmask 7168  }
  0x5f   : > { %v2686_v17 = vpack.c.bf16 %v242_v15, %v242_v15  ;;  %261 = vst [vmem:[#allocation2 + $0x4] sm:$0xf] %v2685_v16  ;;  %v3023_v48 = vld [vmem:[#allocation6 + $0x8] sm:$0xff]   ;;  %s3286_s5 = smov 3   ;;  %s3287_s6 = smov 125   ;;  %vm1121_vm1 = vcmask 23552  }
  0x60   : > { %v3015_v31 = vld [vmem:[#allocation2 + $0x8] ss:$12 sps:$4 sm:$0xff]   ;;  %v3025_v52 = vld [vmem:[#allocation6 + $0x28] sm:$0xff]   ;;  %vm1224_vm2 = vcmask 1022976   ;;  %s3288_s27 = smov 9   ;;  %s3289_s29 = smov 119  }
  0x61   : > { %262 = vst [vmem:[#allocation2 + $0x10] sm:$0xf] %v2686_v17  ;;  %v3010_v23 = vld [vmem:[#allocation2 + $0x18] ss:$12 sps:$4 sm:$0xff]   ;;  %s217_s4 = scalar_lea.vmem [#allocation9], %s2519_s8  ;;  %s2709_s11 = sshll.u32 %s3334_s16, 9 }
  0x62   : > { %390 = vrot.lane.b32.xlu0 %v3010_v23, %s3285_s20  ;;  %v3014_v30 = vld [vmem:[#allocation2] ss:$12 sps:$4 sm:$0xff]   ;;  %s2418_s23 = sshll.u32 %s217_s4, 4  ;;  %s3620_s25 = scalar_lea.hbm %s3668_s3, %s2709_s11  ;;  %s3622_s23 = int_to_ptr.vmem [resolvable:$true] %s2418_s23 }
  0x63   : > { %s2405_s16 = scalar_lea.sflag [#allocation5], %s3445_s7  ;;  %s3206_s26 = scalar_lea.vmem %s3622_s23, 512 }
  0x64   : > { %v461_v18 = vld [vmem:[#allocation2 + $0x1c] sm:$0xff]  ;;  %p3207_p10 = scmp.ne.s32.totalorder %s3622_s23, %s3206_s26  ;;  %p3684_p0 = scmp.ne.s32.totalorder %s3678_s21, 0 }
  0x65   : > { %v462_v19 = vld [vmem:[#allocation2 + $0x28] sm:$0xff]  ;;  %v271_v21 = vld [vmem:[#allocation2 + $0x18] sm:$0xff]  ;;  %s3290_s28 = smov [#allocation9]  }
  0x66   : > { %v3008_v20 = vld [vmem:[#allocation2 + $0x1c] ss:$12 sps:$4 sm:$0xff]   ;;  %v2546_v24 = vcombine.high %v461_v18, %v462_v19  ;;  %p3208_p1 = pnand %p3207_p10, %p3684_p0  ;;  %s3210_s8 = sshll.u32 %s3290_s28, 4  ;;  %s3211_s8 = int_to_ptr.vmem [resolvable:$false] %s3210_s8 }
  0x67   : > { %v272_v22 = vld [vmem:[#allocation2 + $0x24] sm:$0xff]  ;;  %493 = vrot.lane.b32.xlu1 %v3008_v20, %s3284_s18  ;;  %s3212_s10 = scalar_lea.vmem %s3211_s8, 1024  ;;  %p3213_p6 = scmp.lt.s32.totalorder %s3622_s23, %s3211_s8 }
  0x68   : > { %v2538_v25 = vcombine.high %v271_v21, %v272_v22  ;;  %v3012_v26 = vld [vmem:[#allocation2 + $0x4] ss:$12 sps:$4 sm:$0xff]   ;;  %v3018_v27 = vld [vmem:[#allocation2 + $0x1c] ss:$12 sps:$4 sm:$0xff]   ;;  %p3209_p2 = pneg %p3208_p1  ;;  %p3214_p11 = scmp.lt.s32.totalorder %s3212_s10, %s3206_s26 }
  0x69   : > { %v3019_v28 = vld [vmem:[#allocation2 + $0x4] ss:$12 sps:$4 sm:$0xff]   ;;  %2782 = vmatprep.subr.bf16.mxu0 %v3018_v27 }
  0x6a   : > { %392 = vrot.lane.b32.xlu0 %v2538_v25, %s3285_s20  ;;  %2783 = vmatpush3.bf16.msra.mxu0 %v3018_v27  ;;  %v3017_v32 = vld [vmem:[#allocation2 + $0x4] ss:$12 sps:$4 sm:$0xff]   ;;  %p3215_p5 = por %p3214_p11, %p3213_p6 }
  0x6b   : > { %495 = vrot.lane.b32.xlu1 %v2546_v24, %s3284_s18  ;;  %2784 = vmatprep.subr.bf16.mxu0 %v3019_v28 }
  0x6c   : > { %p3216_p9 = pnand %p3215_p5, %p3209_p2 }
  0x6e   : > { %386 = vrot.lane.b32.xlu0 %v3014_v30, %s3285_s20  ;;  %2785 = vmatpush3.bf16.msra.mxu0 %v3019_v28 }
  0x6f   : > { %388 = vrot.lane.b32.xlu1 %v3012_v26, %s3285_s20 }
  0x71   : > { %2787 = vmatmul.mubr.msk.bf16.vlgmr.msra.gmra.mxu0 %vm304_vm6, %v3021_v33 }
  0x72   : > { %489 = vrot.lane.b32.xlu0 %v3017_v32, %s3284_s18  ;;  %2802 = vmatprep.mubr.msk.bf16.mxu0 %vm304_vm6, %v3024_v34 }
  0x73   : > { %491 = vrot.lane.b32.xlu1 %v3015_v31, %s3284_s18  ;;  %v3040_v31 = vld [vmem:[#allocation6 + $0x40] sm:$0xff]  }
  0x76   : > { %577 = vperm.xlu0 %3006, %v563_v36   ;;  %v3029_v36 = vld [vmem:[#allocation2 + $0x18] ss:$12 sps:$4 sm:$0xff]  }
  0x77   : > { %582 = vperm.xlu1 %3007, %v564_v35  }
  0x7a   : > { %572 = vperm.xlu0 %3006, %v562_v38  }
  0x7b   : > { %567 = vperm.xlu1 %3007, %v561_v37   ;;  %v3042_v37 = vld [vmem:[#allocation6 + $0x30] sm:$0xff]  }
  0x7f   : > { %750 = vrot.lane.b32.xlu1 %v3029_v36, %s3285_s20 }
  0xd4   : > { %v391_v40 = vpop.permute.xlu0 %390 }
  0xd9   : > { %v494_v39 = vpop.permute.xlu1 %493 }
  0xdc   : > { %v393_v42 = vpop.permute.xlu0 %392 }
  0xdd   : > { %v496_v41 = vpop.permute.xlu1 %495  ;;  %v396_v44 = vsel %vm394_vm8, %v391_v40, %v393_v42 }
  0xde   : > { %v499_v43 = vsel %vm497_vm7, %v494_v39, %v496_v41  ;;  %2790 = vmatprep.subr.bf16.mxu1 %v396_v44  ;;  %v3031_v39 = vld [vmem:[#allocation2 + $0x20] ss:$12 sps:$4 sm:$0xff]   ;;  %v3041_v41 = vld [vmem:[#allocation6 + $0x48] sm:$0xff]  }
  0xdf   : > { %2798 = vmatprep.subr.bf16.mxu0 %v499_v43  ;;  %2791 = vmatpush3.bf16.msra.mxu1 %v396_v44  ;;  %v3044_v44 = vld [vmem:[#allocation6 + $0x50] sm:$0xff]  }
  0xe0   : > { %2799 = vmatpush3.bf16.msra.mxu0 %v499_v43  ;;  %v387_v46 = vpop.permute.xlu0 %386  ;;  %v3036_v43 = vld [vmem:[#allocation2] ss:$12 sps:$4 sm:$0xff]  }
  0xe1   : > { %v389_v45 = vpop.permute.xlu1 %388 }
  0xe2   : > { %v395_v47 = vsel %vm394_vm8, %v387_v46, %v389_v45  ;;  %v3037_v45 = vld [vmem:[#allocation2 + $0x8] ss:$12 sps:$4 sm:$0xff]  }
  0xe3   : > { %2792 = vmatprep.subr.bf16.mxu1 %v395_v47 }
  0xe4   : > { %2793 = vmatpush3.bf16.msra.mxu1 %v395_v47  ;;  %v490_v50 = vpop.permute.xlu0 %489  ;;  %v923_v47 = vld [vmem:[#allocation8 + $0x38] sm:$0xff] }
  0xe5   : > { %v492_v49 = vpop.permute.xlu1 %491 }
  0xe6   : > { %v498_v51 = vsel %vm497_vm7, %v490_v50, %v492_v49  ;;  %v921_v49 = vld [vmem:[#allocation8 + $0x28] sm:$0xff]  ;;  %v920_v50 = vld [vmem:[#allocation8 + $0x20] sm:$0xff] }
  0xe7   : > { %2795 = vmatmul.mubr.msk.bf16.vlgmr.msra.gmra.mxu1 %vm304_vm6, %v3023_v48  ;;  %2800 = vmatprep.subr.bf16.mxu0 %v498_v51  ;;  %v922_v48 = vld [vmem:[#allocation8 + $0x30] sm:$0xff] }
  0xe8   : > { %2801 = vmatpush3.bf16.msra.mxu0 %v498_v51  ;;  %2810 = vmatprep.mubr.msk.bf16.mxu1 %vm304_vm6, %v3040_v31 }
  0xeb   : > { %2803 = vmatmul.mubr.msk.bf16.vlgmr.msra.gmra.mxu0 %vm304_vm6, %v3025_v52 }
  0xec   : > { %2818 = vmatprep.mubr.msk.bf16.mxu0 %vm304_vm6, %v3042_v37 }
  0xf1   : > { %v578_v61 = vpop.permute.xlu0 %577 }
  0xf2   : > { %v583_v57 = vpop.permute.xlu1 %582 }
  0xf5   : > { %v573_v25 = vpop.permute.xlu0 %572 }
  0xf6   : > { %v568_v7 = vpop.permute.xlu1 %567 }
  0xfa   : > { %v751_v51 = vpop.permute.xlu1 %750 }
 0x131   : > { %v2788_v53 = vpop.f32.mrf.mxu0 }
 0x133   : > { %v345_v54 = vpop.f32.mrf.mxu0 }
 0x135   : > { %v2789_v55 = vpop.f32.mrf.mxu0 }
 0x137   : > { %v348_v58 = vpop.f32.mrf.mxu0 }
 0x1a7   : > { %v2796_v56 = vpop.f32.mrf.mxu1 }
 0x1a8   : > { %v448_v60 = vadd.f32 %v2796_v56, %v2788_v53 }
 0x1a9   : > { %v439_v59 = vpop.f32.mrf.mxu1 }
 0x1aa   : > { %v440_v0 = vadd.f32 %v439_v59, %v345_v54 }
 0x1ab   : > { %v2797_v62 = vpop.f32.mrf.mxu1  ;;  %v2804_v63 = vpop.f32.mrf.mxu0 }
 0x1ac   : > { %v559_v4 = vadd.f32 %v2804_v63, %v448_v60  ;;  %v451_v8 = vadd.f32 %v2797_v62, %v2789_v55  ;;  %v3043_v60 = vld [vmem:[#allocation6 + $0x38] sm:$0xff]  }
 0x1ad   : > { %v542_v5 = vpop.f32.mrf.mxu0  ;;  %v442_v9 = vpop.f32.mrf.mxu1 }
 0x1ae   : > { %v557_v10 = vadd.f32 %v542_v5, %v440_v0  ;;  %v587_v11 = vadd.f32 %v578_v61, %v559_v4  ;;  %v443_v16 = vadd.f32 %v442_v9, %v348_v58  ;;  %v3045_v0 = vld [vmem:[#allocation6 + $0x58] sm:$0xff]  }
 0x1af   : > { %v2805_v12 = vpop.f32.mrf.mxu0 }
 0x1b0   : > { %vm591_vm9 = vcmp.ge.f32.partialorder %v587_v11, 0.0  ;;  %v595_v13 = vmul.f32 0.01, %v587_v11  ;;  %v585_v14 = vadd.f32 %v568_v7, %v557_v10  ;;  %v560_v15 = vadd.f32 %v2805_v12, %v451_v8 }
 0x1b1   : > { %v545_v17 = vpop.f32.mrf.mxu0 }
 0x1b2   : > { %v599_v18 = vsel %vm591_vm9, %v587_v11, %v595_v13  ;;  %vm589_vm10 = vcmp.ge.f32.partialorder %v585_v14, 0.0  ;;  %v593_v19 = vmul.f32 0.01, %v585_v14  ;;  %v588_v20 = vadd.f32 %v583_v57, %v560_v15 }
 0x1b3   : > { %v2691_v21 = vpack.c.bf16 %v599_v18, %v599_v18  ;;  %v558_v22 = vadd.f32 %v545_v17, %v443_v16 }
 0x1b4   : > { %v597_v23 = vsel %vm589_vm10, %v585_v14, %v593_v19  ;;  %vm592_vm11 = vcmp.ge.f32.partialorder %v588_v20, 0.0  ;;  %v596_v24 = vmul.f32 0.01, %v588_v20 }
 0x1b5   : > { %619 = vst [vmem:[#allocation2 + $0x1c] sm:$0xf] %v2691_v21  ;;  %v2689_v26 = vpack.c.bf16 %v597_v23, %v597_v23  ;;  %v586_v27 = vadd.f32 %v573_v25, %v558_v22 }
 0x1b6   : > { %v600_v28 = vsel %vm592_vm11, %v588_v20, %v596_v24 }
 0x1b7   : > { %617 = vst [vmem:[#allocation2 + $0x4] sm:$0xf] %v2689_v26  ;;  %v2692_v29 = vpack.c.bf16 %v600_v28, %v600_v28  ;;  %vm590_vm12 = vcmp.ge.f32.partialorder %v586_v27, 0.0  ;;  %v594_v30 = vmul.f32 0.01, %v586_v27 }
 0x1b9   : > { %620 = vst [vmem:[#allocation2 + $0x28] sm:$0xf] %v2692_v29  ;;  %v598_v32 = vsel %vm590_vm12, %v586_v27, %v594_v30 }
 0x1ba   : > { %v2690_v33 = vpack.c.bf16 %v598_v32, %v598_v32 }
 0x1bc   : > { %618 = vst [vmem:[#allocation2 + $0x10] sm:$0xf] %v2690_v33 }
 0x1c0   : > { %v3026_v34 = vld [vmem:[#allocation2 + $0x1c] ss:$12 sps:$4 sm:$0xff]  }
 0x1c1   : > { %v3027_v35 = vld [vmem:[#allocation2 + $0x1c] ss:$12 sps:$4 sm:$0xff]   ;;  %2806 = vmatprep.subr.bf16.mxu1 %v3026_v34 }
 0x1c2   : > { %752 = vrot.lane.b32.xlu0 %v3027_v35, %s3285_s20  ;;  %2807 = vmatpush3.bf16.msra.mxu1 %v3026_v34  ;;  %v3033_v40 = vld [vmem:[#allocation2 + $0x1c] ss:$12 sps:$4 sm:$0xff]  }
 0x1c3   : > { %v3030_v38 = vld [vmem:[#allocation2 + $0x4] ss:$12 sps:$4 sm:$0xff]   ;;  %852 = vrot.lane.b32.xlu1 %v3033_v40, %s3284_s18 }
 0x1c4   : > { %2808 = vmatprep.subr.bf16.mxu1 %v3030_v38  ;;  %v3034_v42 = vld [vmem:[#allocation2 + $0x4] ss:$12 sps:$4 sm:$0xff]  }
 0x1c5   : > { %v3039_v46 = vld [vmem:[#allocation2 + $0x4] ss:$12 sps:$4 sm:$0xff]  }
 0x1c6   : > { %854 = vrot.lane.b32.xlu0 %v3031_v39, %s3284_s18  ;;  %2809 = vmatpush3.bf16.msra.mxu1 %v3030_v38 }
 0x1c7   : > { %746 = vrot.lane.b32.xlu1 %v3036_v43, %s3285_s20 }
 0x1c9   : > { %2811 = vmatmul.mubr.msk.bf16.vlgmr.msra.gmra.mxu1 %vm304_vm6, %v3041_v41 }
 0x1ca   : > { %748 = vrot.lane.b32.xlu0 %v3034_v42, %s3285_s20  ;;  %2826 = vmatprep.mubr.msk.bf16.mxu1 %vm304_vm6, %v3044_v44  ;;  %v3060_v44 = vld [vmem:[#allocation6 + $0x70] sm:$0xff]  }
 0x1cb   : > { %848 = vrot.lane.b32.xlu1 %v3039_v46, %s3284_s18 }
 0x1ce   : > { %850 = vrot.lane.b32.xlu0 %v3037_v45, %s3284_s18 }
 0x1cf   : > { %936 = vperm.xlu1 %3007, %v922_v48  }
 0x1d2   : > { %941 = vperm.xlu0 %3006, %v923_v47  }
 0x1d3   : > { %926 = vperm.xlu1 %3007, %v920_v50  }
 0x1d6   : > { %931 = vperm.xlu0 %3006, %v921_v49   ;;  %v3062_v49 = vld [vmem:[#allocation6 + $0x60] sm:$0xff]  }
 0x234   : > { %v753_v52 = vpop.permute.xlu0 %752 }
 0x235   : > { %v755_v53 = vsel %vm394_vm8, %v751_v51, %v753_v52  ;;  %v853_v54 = vpop.permute.xlu1 %852  ;;  %v3051_v51 = vld [vmem:[#allocation2 + $0x20] ss:$12 sps:$4 sm:$0xff]  }
 0x236   : > { %2814 = vmatprep.subr.bf16.mxu0 %v755_v53 }
 0x237   : > { %2815 = vmatpush3.bf16.msra.mxu0 %v755_v53  ;;  %v3061_v53 = vld [vmem:[#allocation6 + $0x78] sm:$0xff]  }
 0x238   : > { %v855_v55 = vpop.permute.xlu0 %854 }
 0x239   : > { %v857_v56 = vsel %vm497_vm7, %v853_v54, %v855_v55  ;;  %v747_v57 = vpop.permute.xlu1 %746  ;;  %v3056_v55 = vld [vmem:[#allocation2] ss:$12 sps:$4 sm:$0xff]  }
 0x23a   : > { %2822 = vmatprep.subr.bf16.mxu1 %v857_v56 }
 0x23b   : > { %2823 = vmatpush3.bf16.msra.mxu1 %v857_v56  ;;  %v3064_v56 = vld [vmem:[#allocation6 + $0x80] sm:$0xff]  }
 0x23c   : > { %v749_v58 = vpop.permute.xlu0 %748 }
 0x23d   : > { %v754_v59 = vsel %vm394_vm8, %v747_v57, %v749_v58  ;;  %v849_v61 = vpop.permute.xlu1 %848  ;;  %v3057_v57 = vld [vmem:[#allocation2 + $0x8] ss:$12 sps:$4 sm:$0xff]  }
 0x23e   : > { %2816 = vmatprep.subr.bf16.mxu0 %v754_v59 }
 0x23f   : > { %2817 = vmatpush3.bf16.msra.mxu0 %v754_v59  ;;  %v1292_v59 = vld [vmem:[#allocation8 + $0x58] sm:$0xff] }
 0x240   : > { %v851_v62 = vpop.permute.xlu0 %850 }
 0x241   : > { %v856_v63 = vsel %vm497_vm7, %v849_v61, %v851_v62  ;;  %v1290_v61 = vld [vmem:[#allocation8 + $0x48] sm:$0xff]  ;;  %v1289_v62 = vld [vmem:[#allocation8 + $0x40] sm:$0xff] }
 0x242   : > { %2819 = vmatmul.mubr.msk.bf16.vlgmr.msra.gmra.mxu0 %vm304_vm6, %v3043_v60  ;;  %2824 = vmatprep.subr.bf16.mxu1 %v856_v63  ;;  %v1291_v60 = vld [vmem:[#allocation8 + $0x50] sm:$0xff] }
 0x243   : > { %2825 = vmatpush3.bf16.msra.mxu1 %v856_v63  ;;  %2834 = vmatprep.mubr.msk.bf16.mxu0 %vm304_vm6, %v3060_v44 }
 0x246   : > { %2827 = vmatmul.mubr.msk.bf16.vlgmr.msra.gmra.mxu1 %vm304_vm6, %v3045_v0 }
 0x247   : > { %2842 = vmatprep.mubr.msk.bf16.mxu1 %vm304_vm6, %v3062_v49 }
 0x24a   : > { %v937_v9 = vpop.permute.xlu1 %936 }
 0x24d   : > { %v942_v18 = vpop.permute.xlu0 %941 }
 0x24e   : > { %v927_v23 = vpop.permute.xlu1 %926 }
 0x251   : > { %v932_v34 = vpop.permute.xlu0 %931 }
 0x289   : > { %v2812_v4 = vpop.f32.mrf.mxu1 }
 0x28b   : > { %v705_v5 = vpop.f32.mrf.mxu1 }
 0x28d   : > { %v2813_v7 = vpop.f32.mrf.mxu1 }
 0x28f   : > { %v708_v10 = vpop.f32.mrf.mxu1 }
 0x302   : > { %v2820_v8 = vpop.f32.mrf.mxu0 }
 0x303   : > { %v807_v12 = vadd.f32 %v2820_v8, %v2812_v4 }
 0x304   : > { %v798_v11 = vpop.f32.mrf.mxu0 }
 0x305   : > { %v799_v15 = vadd.f32 %v798_v11, %v705_v5 }
 0x306   : > { %v2821_v13 = vpop.f32.mrf.mxu0  ;;  %v2828_v14 = vpop.f32.mrf.mxu1 }
 0x307   : > { %v917_v16 = vadd.f32 %v2828_v14, %v807_v12  ;;  %v810_v19 = vadd.f32 %v2821_v13, %v2813_v7  ;;  %v3063_v12 = vld [vmem:[#allocation6 + $0x68] sm:$0xff]  }
 0x308   : > { %v900_v17 = vpop.f32.mrf.mxu1  ;;  %v801_v21 = vpop.f32.mrf.mxu0 }
 0x309   : > { %v946_v20 = vadd.f32 %v937_v9, %v917_v16  ;;  %v915_v22 = vadd.f32 %v900_v17, %v799_v15  ;;  %v802_v28 = vadd.f32 %v801_v21, %v708_v10  ;;  %v3065_v16 = vld [vmem:[#allocation6 + $0x88] sm:$0xff]  }
 0x30a   : > { %v2829_v24 = vpop.f32.mrf.mxu1 }
 0x30b   : > { %v3516_v25 = vadd.f32 %v946_v20, %v3459_v1  ;;  %v944_v26 = vadd.f32 %v927_v23, %v915_v22  ;;  %v918_v27 = vadd.f32 %v2829_v24, %v810_v19 }
 0x30c   : > { %v903_v29 = vpop.f32.mrf.mxu1 }
 0x30d   : > { %vm962_vm13 = vcmp.ge.f32.partialorder %v3516_v25, 0.0  ;;  %v966_v30 = vmul.f32 0.01, %v3516_v25  ;;  %v3521_v31 = vadd.f32 %v944_v26, %v3463_v3  ;;  %v947_v32 = vadd.f32 %v942_v18, %v918_v27 }
 0x30e   : > { %v916_v33 = vadd.f32 %v903_v29, %v802_v28 }
 0x30f   : > { %v970_v35 = vsel %vm962_vm13, %v3516_v25, %v966_v30  ;;  %vm960_vm14 = vcmp.ge.f32.partialorder %v3521_v31, 0.0  ;;  %v964_v1 = vmul.f32 0.01, %v3521_v31  ;;  %v3527_v36 = vadd.f32 %v947_v32, %v3461_v2 }
 0x310   : > { %v2695_v37 = vpack.c.bf16 %v970_v35, %v970_v35  ;;  %v945_v38 = vadd.f32 %v932_v34, %v916_v33 }
 0x311   : > { %v968_v39 = vsel %vm960_vm14, %v3521_v31, %v964_v1  ;;  %vm963_vm15 = vcmp.ge.f32.partialorder %v3527_v36, 0.0  ;;  %v967_v3 = vmul.f32 0.01, %v3527_v36  ;;  %vm1845_vm14 = vcmask 72704  }
 0x312   : > { %990 = vst [vmem:[#allocation2 + $0x1c] sm:$0xf] %v2695_v37  ;;  %v2693_v40 = vpack.c.bf16 %v968_v39, %v968_v39  ;;  %v3533_v41 = vadd.f32 %v945_v38, %v3469_v6  ;;  %v3049_v6 = vld [vmem:[#allocation2 + $0x18] ss:$12 sps:$4 sm:$0xff]  }
 0x313   : > { %v971_v42 = vsel %vm963_vm15, %v3527_v36, %v967_v3  ;;  %1117 = vrot.lane.b32.xlu1 %v3049_v6, %s3286_s5  ;;  %vm1948_vm15 = vcmask 973824  }
 0x314   : > { %988 = vst [vmem:[#allocation2 + $0x4] sm:$0xf] %v2693_v40  ;;  %v2696_v43 = vpack.c.bf16 %v971_v42, %v971_v42  ;;  %vm961_vm0 = vcmp.ge.f32.partialorder %v3533_v41, 0.0  ;;  %v965_v2 = vmul.f32 0.01, %v3533_v41 }
 0x316   : > { %991 = vst [vmem:[#allocation2 + $0x28] sm:$0xf] %v2696_v43  ;;  %v969_v45 = vsel %vm961_vm0, %v3533_v41, %v965_v2 }
 0x317   : > { %v2694_v46 = vpack.c.bf16 %v969_v45, %v969_v45 }
 0x319   : > { %989 = vst [vmem:[#allocation2 + $0x10] sm:$0xf] %v2694_v46 }
 0x31d   : > { %v3046_v47 = vld [vmem:[#allocation2 + $0x1c] ss:$12 sps:$4 sm:$0xff]  }
 0x31e   : > { %v3047_v48 = vld [vmem:[#allocation2 + $0x1c] ss:$12 sps:$4 sm:$0xff]   ;;  %2830 = vmatprep.subr.bf16.mxu0 %v3046_v47 }
 0x31f   : > { %1119 = vrot.lane.b32.xlu0 %v3047_v48, %s3286_s5  ;;  %2831 = vmatpush3.bf16.msra.mxu0 %v3046_v47  ;;  %v3053_v52 = vld [vmem:[#allocation2 + $0x1c] ss:$12 sps:$4 sm:$0xff]  }
 0x320   : > { %v3050_v50 = vld [vmem:[#allocation2 + $0x4] ss:$12 sps:$4 sm:$0xff]   ;;  %1220 = vrot.lane.b32.xlu1 %v3053_v52, %s3287_s6 }
 0x321   : > { %2832 = vmatprep.subr.bf16.mxu0 %v3050_v50  ;;  %v3054_v54 = vld [vmem:[#allocation2 + $0x4] ss:$12 sps:$4 sm:$0xff]  }
 0x322   : > { %v3059_v58 = vld [vmem:[#allocation2 + $0x4] ss:$12 sps:$4 sm:$0xff]  }
 0x323   : > { %1222 = vrot.lane.b32.xlu0 %v3051_v51, %s3287_s6  ;;  %2833 = vmatpush3.bf16.msra.mxu0 %v3050_v50 }
 0x324   : > { %1113 = vrot.lane.b32.xlu1 %v3056_v55, %s3286_s5  ;;  %v3080_v55 = vld [vmem:[#allocation6 + $0xa0] sm:$0xff]  }
 0x326   : > { %2835 = vmatmul.mubr.msk.bf16.vlgmr.msra.gmra.mxu0 %vm304_vm6, %v3061_v53 }
 0x327   : > { %1115 = vrot.lane.b32.xlu0 %v3054_v54, %s3286_s5  ;;  %2850 = vmatprep.mubr.msk.bf16.mxu0 %vm304_vm6, %v3064_v56 }
 0x328   : > { %1216 = vrot.lane.b32.xlu1 %v3059_v58, %s3287_s6 }
 0x32b   : > { %1218 = vrot.lane.b32.xlu0 %v3057_v57, %s3287_s6 }
 0x32c   : > { %1305 = vperm.xlu1 %3007, %v1291_v60   ;;  %v3069_v60 = vld [vmem:[#allocation2 + $0x18] ss:$12 sps:$4 sm:$0xff]  }
 0x32f   : > { %1310 = vperm.xlu0 %3006, %v1292_v59  }
 0x330   : > { %1295 = vperm.xlu1 %3007, %v1289_v62  }
 0x333   : > { %1300 = vperm.xlu0 %3006, %v1290_v61   ;;  %v3082_v61 = vld [vmem:[#allocation6 + $0x90] sm:$0xff]  }
 0x334   : > { %1474 = vrot.lane.b32.xlu1 %v3069_v60, %s3285_s20 }
 0x385   : > { %v1118_v63 = vpop.permute.xlu1 %1117 }
 0x391   : > { %v1120_v0 = vpop.permute.xlu0 %1119 }
 0x392   : > { %v1123_v4 = vsel %vm1121_vm1, %v1118_v63, %v1120_v0  ;;  %v1221_v5 = vpop.permute.xlu1 %1220  ;;  %v3071_v63 = vld [vmem:[#allocation2 + $0x20] ss:$12 sps:$4 sm:$0xff]  }
 0x393   : > { %2838 = vmatprep.subr.bf16.mxu1 %v1123_v4 }
 0x394   : > { %2839 = vmatpush3.bf16.msra.mxu1 %v1123_v4  ;;  %v3081_v4 = vld [vmem:[#allocation6 + $0xa8] sm:$0xff]  }
 0x395   : > { %v1223_v7 = vpop.permute.xlu0 %1222 }
 0x396   : > { %v1226_v8 = vsel %vm1224_vm2, %v1221_v5, %v1223_v7  ;;  %v1114_v9 = vpop.permute.xlu1 %1113  ;;  %v3076_v7 = vld [vmem:[#allocation2] ss:$12 sps:$4 sm:$0xff]  }
 0x397   : > { %2846 = vmatprep.subr.bf16.mxu0 %v1226_v8 }
 0x398   : > { %2847 = vmatpush3.bf16.msra.mxu0 %v1226_v8  ;;  %v3084_v8 = vld [vmem:[#allocation6 + $0xb0] sm:$0xff]  }
 0x399   : > { %v1116_v10 = vpop.permute.xlu0 %1115 }
 0x39a   : > { %v1122_v11 = vsel %vm1121_vm1, %v1114_v9, %v1116_v10  ;;  %v1217_v13 = vpop.permute.xlu1 %1216  ;;  %v3077_v9 = vld [vmem:[#allocation2 + $0x8] ss:$12 sps:$4 sm:$0xff]  }
 0x39b   : > { %2840 = vmatprep.subr.bf16.mxu1 %v1122_v11 }
 0x39c   : > { %2841 = vmatpush3.bf16.msra.mxu1 %v1122_v11  ;;  %v1647_v11 = vld [vmem:[#allocation8 + $0x78] sm:$0xff] }
 0x39d   : > { %v1219_v14 = vpop.permute.xlu0 %1218 }
 0x39e   : > { %v1225_v15 = vsel %vm1224_vm2, %v1217_v13, %v1219_v14  ;;  %v1645_v13 = vld [vmem:[#allocation8 + $0x68] sm:$0xff]  ;;  %v1644_v14 = vld [vmem:[#allocation8 + $0x60] sm:$0xff] }
 0x39f   : > { %2843 = vmatmul.mubr.msk.bf16.vlgmr.msra.gmra.mxu1 %vm304_vm6, %v3063_v12  ;;  %2848 = vmatprep.subr.bf16.mxu0 %v1225_v15  ;;  %v1646_v12 = vld [vmem:[#allocation8 + $0x70] sm:$0xff] }
 0x3a0   : > { %2849 = vmatpush3.bf16.msra.mxu0 %v1225_v15  ;;  %2858 = vmatprep.mubr.msk.bf16.mxu1 %vm304_vm6, %v3080_v55 }
 0x3a3   : > { %2851 = vmatmul.mubr.msk.bf16.vlgmr.msra.gmra.mxu0 %vm304_vm6, %v3065_v16 }
 0x3a4   : > { %2866 = vmatprep.mubr.msk.bf16.mxu0 %vm304_vm6, %v3082_v61 }
 0x3a7   : > { %v1306_v21 = vpop.permute.xlu1 %1305 }
 0x3aa   : > { %v1311_v32 = vpop.permute.xlu0 %1310 }
 0x3ab   : > { %v1296_v37 = vpop.permute.xlu1 %1295 }
 0x3ae   : > { %v1301_v48 = vpop.permute.xlu0 %1300 }
 0x3af   : > { %v1475_v15 = vpop.permute.xlu1 %1474 }
 0x3e6   : > { %v2836_v17 = vpop.f32.mrf.mxu0 }
 0x3e8   : > { %v1072_v18 = vpop.f32.mrf.mxu0 }
 0x3ea   : > { %v2837_v19 = vpop.f32.mrf.mxu0 }
 0x3ec   : > { %v1075_v22 = vpop.f32.mrf.mxu0 }
 0x45f   : > { %v2844_v20 = vpop.f32.mrf.mxu1 }
 0x460   : > { %v1175_v24 = vadd.f32 %v2844_v20, %v2836_v17 }
 0x461   : > { %v1166_v23 = vpop.f32.mrf.mxu1 }
 0x462   : > { %v1167_v28 = vadd.f32 %v1166_v23, %v1072_v18 }
 0x463   : > { %v2845_v26 = vpop.f32.mrf.mxu1  ;;  %v2852_v27 = vpop.f32.mrf.mxu0 }
 0x464   : > { %v1286_v29 = vadd.f32 %v2852_v27, %v1175_v24  ;;  %v1178_v33 = vadd.f32 %v2845_v26, %v2837_v19  ;;  %v3083_v24 = vld [vmem:[#allocation6 + $0x98] sm:$0xff]  }
 0x465   : > { %v1269_v30 = vpop.f32.mrf.mxu0  ;;  %v1169_v35 = vpop.f32.mrf.mxu1 }
 0x466   : > { %v1315_v34 = vadd.f32 %v1306_v21, %v1286_v29  ;;  %v1284_v1 = vadd.f32 %v1269_v30, %v1167_v28  ;;  %v1170_v42 = vadd.f32 %v1169_v35, %v1075_v22  ;;  %v3085_v29 = vld [vmem:[#allocation6 + $0xb8] sm:$0xff]  }
 0x467   : > { %v2853_v38 = vpop.f32.mrf.mxu0 }
 0x468   : > { %vm1319_vm3 = vcmp.ge.f32.partialorder %v1315_v34, 0.0  ;;  %v1323_v39 = vmul.f32 0.01, %v1315_v34  ;;  %v1313_v3 = vadd.f32 %v1296_v37, %v1284_v1  ;;  %v1287_v40 = vadd.f32 %v2853_v38, %v1178_v33 }
 0x469   : > { %v1272_v43 = vpop.f32.mrf.mxu0 }
 0x46a   : > { %v1327_v2 = vsel %vm1319_vm3, %v1315_v34, %v1323_v39  ;;  %vm1317_vm4 = vcmp.ge.f32.partialorder %v1313_v3, 0.0  ;;  %v1321_v44 = vmul.f32 0.01, %v1313_v3  ;;  %v1316_v45 = vadd.f32 %v1311_v32, %v1287_v40 }
 0x46b   : > { %v2699_v46 = vpack.c.bf16 %v1327_v2, %v1327_v2  ;;  %v1285_v47 = vadd.f32 %v1272_v43, %v1170_v42 }
 0x46c   : > { %v1325_v6 = vsel %vm1317_vm4, %v1313_v3, %v1321_v44  ;;  %vm1320_vm5 = vcmp.ge.f32.partialorder %v1316_v45, 0.0  ;;  %v1324_v49 = vmul.f32 0.01, %v1316_v45 }
 0x46d   : > { %1347 = vst [vmem:[#allocation2 + $0x1c] sm:$0xf] %v2699_v46  ;;  %v2697_v50 = vpack.c.bf16 %v1325_v6, %v1325_v6  ;;  %v1314_v51 = vadd.f32 %v1301_v48, %v1285_v47 }
 0x46e   : > { %v1328_v52 = vsel %vm1320_vm5, %v1316_v45, %v1324_v49 }
 0x46f   : > { %1345 = vst [vmem:[#allocation2 + $0x4] sm:$0xf] %v2697_v50  ;;  %v2700_v53 = vpack.c.bf16 %v1328_v52, %v1328_v52  ;;  %vm1318_vm9 = vcmp.ge.f32.partialorder %v1314_v51, 0.0  ;;  %v1322_v54 = vmul.f32 0.01, %v1314_v51 }
 0x471   : > { %1348 = vst [vmem:[#allocation2 + $0x28] sm:$0xf] %v2700_v53  ;;  %v1326_v56 = vsel %vm1318_vm9, %v1314_v51, %v1322_v54 }
 0x472   : > { %v2698_v57 = vpack.c.bf16 %v1326_v56, %v1326_v56 }
 0x474   : > { %1346 = vst [vmem:[#allocation2 + $0x10] sm:$0xf] %v2698_v57 }
 0x478   : > { %v3066_v58 = vld [vmem:[#allocation2 + $0x1c] ss:$12 sps:$4 sm:$0xff]  }
 0x479   : > { %v3067_v59 = vld [vmem:[#allocation2 + $0x1c] ss:$12 sps:$4 sm:$0xff]   ;;  %2854 = vmatprep.subr.bf16.mxu1 %v3066_v58 }
 0x47a   : > { %1476 = vrot.lane.b32.xlu0 %v3067_v59, %s3285_s20  ;;  %2855 = vmatpush3.bf16.msra.mxu1 %v3066_v58  ;;  %v3073_v0 = vld [vmem:[#allocation2 + $0x1c] ss:$12 sps:$4 sm:$0xff]  }
 0x47b   : > { %v3070_v62 = vld [vmem:[#allocation2 + $0x4] ss:$12 sps:$4 sm:$0xff]   ;;  %1576 = vrot.lane.b32.xlu1 %v3073_v0, %s3284_s18 }
 0x47c   : > { %2856 = vmatprep.subr.bf16.mxu1 %v3070_v62  ;;  %v3074_v5 = vld [vmem:[#allocation2 + $0x4] ss:$12 sps:$4 sm:$0xff]  }
 0x47d   : > { %v3079_v10 = vld [vmem:[#allocation2 + $0x4] ss:$12 sps:$4 sm:$0xff]  }
 0x47e   : > { %1578 = vrot.lane.b32.xlu0 %v3071_v63, %s3284_s18  ;;  %2857 = vmatpush3.bf16.msra.mxu1 %v3070_v62 }
 0x47f   : > { %1470 = vrot.lane.b32.xlu1 %v3076_v7, %s3285_s20 }
 0x481   : > { %2859 = vmatmul.mubr.msk.bf16.vlgmr.msra.gmra.mxu1 %vm304_vm6, %v3081_v4 }
 0x482   : > { %1472 = vrot.lane.b32.xlu0 %v3074_v5, %s3285_s20  ;;  %2874 = vmatprep.mubr.msk.bf16.mxu1 %vm304_vm6, %v3084_v8  ;;  %v3100_v8 = vld [vmem:[#allocation6 + $0xd0] sm:$0xff]  }
 0x483   : > { %1572 = vrot.lane.b32.xlu1 %v3079_v10, %s3284_s18 }
 0x486   : > { %1574 = vrot.lane.b32.xlu0 %v3077_v9, %s3284_s18 }
 0x487   : > { %1660 = vperm.xlu1 %3007, %v1646_v12  }
 0x48a   : > { %1665 = vperm.xlu0 %3006, %v1647_v11  }
 0x48b   : > { %1650 = vperm.xlu1 %3007, %v1644_v14  }
 0x48e   : > { %1655 = vperm.xlu0 %3006, %v1645_v13   ;;  %v3102_v13 = vld [vmem:[#allocation6 + $0xc0] sm:$0xff]  }
 0x4ec   : > { %v1477_v16 = vpop.permute.xlu0 %1476 }
 0x4ed   : > { %v1479_v17 = vsel %vm394_vm8, %v1475_v15, %v1477_v16  ;;  %v1577_v18 = vpop.permute.xlu1 %1576  ;;  %v3091_v15 = vld [vmem:[#allocation2 + $0x20] ss:$12 sps:$4 sm:$0xff]  }
 0x4ee   : > { %2862 = vmatprep.subr.bf16.mxu0 %v1479_v17 }
 0x4ef   : > { %2863 = vmatpush3.bf16.msra.mxu0 %v1479_v17  ;;  %v3101_v17 = vld [vmem:[#allocation6 + $0xd8] sm:$0xff]  }
 0x4f0   : > { %v1579_v19 = vpop.permute.xlu0 %1578 }
 0x4f1   : > { %v1581_v20 = vsel %vm497_vm7, %v1577_v18, %v1579_v19  ;;  %v1471_v21 = vpop.permute.xlu1 %1470  ;;  %v3096_v19 = vld [vmem:[#allocation2] ss:$12 sps:$4 sm:$0xff]  }
 0x4f2   : > { %2870 = vmatprep.subr.bf16.mxu1 %v1581_v20 }
 0x4f3   : > { %2871 = vmatpush3.bf16.msra.mxu1 %v1581_v20  ;;  %v3104_v20 = vld [vmem:[#allocation6 + $0xe0] sm:$0xff]  }
 0x4f4   : > { %v1473_v22 = vpop.permute.xlu0 %1472 }
 0x4f5   : > { %v1478_v23 = vsel %vm394_vm8, %v1471_v21, %v1473_v22  ;;  %v1573_v26 = vpop.permute.xlu1 %1572  ;;  %v3097_v21 = vld [vmem:[#allocation2 + $0x8] ss:$12 sps:$4 sm:$0xff]  }
 0x4f6   : > { %2864 = vmatprep.subr.bf16.mxu0 %v1478_v23 }
 0x4f7   : > { %2865 = vmatpush3.bf16.msra.mxu0 %v1478_v23  ;;  %v2016_v23 = vld [vmem:[#allocation8 + $0x98] sm:$0xff] }
 0x4f8   : > { %v1575_v27 = vpop.permute.xlu0 %1574 }
 0x4f9   : > { %v1580_v28 = vsel %vm497_vm7, %v1573_v26, %v1575_v27  ;;  %v2014_v26 = vld [vmem:[#allocation8 + $0x88] sm:$0xff]  ;;  %v2013_v27 = vld [vmem:[#allocation8 + $0x80] sm:$0xff] }
 0x4fa   : > { %2867 = vmatmul.mubr.msk.bf16.vlgmr.msra.gmra.mxu0 %vm304_vm6, %v3083_v24  ;;  %2872 = vmatprep.subr.bf16.mxu1 %v1580_v28  ;;  %v2015_v24 = vld [vmem:[#allocation8 + $0x90] sm:$0xff] }
 0x4fb   : > { %2873 = vmatpush3.bf16.msra.mxu1 %v1580_v28  ;;  %2882 = vmatprep.mubr.msk.bf16.mxu0 %vm304_vm6, %v3100_v8 }
 0x4fe   : > { %2875 = vmatmul.mubr.msk.bf16.vlgmr.msra.gmra.mxu1 %vm304_vm6, %v3085_v29 }
 0x4ff   : > { %2890 = vmatprep.mubr.msk.bf16.mxu1 %vm304_vm6, %v3102_v13 }
 0x502   : > { %v1661_v35 = vpop.permute.xlu1 %1660 }
 0x505   : > { %v1666_v2 = vpop.permute.xlu0 %1665 }
 0x506   : > { %v1651_v48 = vpop.permute.xlu1 %1650 }
 0x509   : > { %v1656_v58 = vpop.permute.xlu0 %1655 }
 0x541   : > { %v2860_v30 = vpop.f32.mrf.mxu1 }
 0x543   : > { %v1429_v32 = vpop.f32.mrf.mxu1 }
 0x545   : > { %v2861_v33 = vpop.f32.mrf.mxu1 }
 0x547   : > { %v1432_v1 = vpop.f32.mrf.mxu1 }
 0x5ba   : > { %v2868_v34 = vpop.f32.mrf.mxu0 }
 0x5bb   : > { %v1531_v38 = vadd.f32 %v2868_v34, %v2860_v30 }
 0x5bc   : > { %v1522_v37 = vpop.f32.mrf.mxu0 }
 0x5bd   : > { %v1523_v40 = vadd.f32 %v1522_v37, %v1429_v32 }
 0x5be   : > { %v2869_v39 = vpop.f32.mrf.mxu0  ;;  %v2876_v3 = vpop.f32.mrf.mxu1 }
 0x5bf   : > { %v1641_v42 = vadd.f32 %v2876_v3, %v1531_v38  ;;  %v1534_v44 = vadd.f32 %v2869_v39, %v2861_v33  ;;  %v3103_v38 = vld [vmem:[#allocation6 + $0xc8] sm:$0xff]  }
 0x5c0   : > { %v1624_v43 = vpop.f32.mrf.mxu1  ;;  %v1525_v46 = vpop.f32.mrf.mxu0 }
 0x5c1   : > { %v1670_v45 = vadd.f32 %v1661_v35, %v1641_v42  ;;  %v1639_v47 = vadd.f32 %v1624_v43, %v1523_v40  ;;  %v1526_v52 = vadd.f32 %v1525_v46, %v1432_v1  ;;  %v3105_v42 = vld [vmem:[#allocation6 + $0xe8] sm:$0xff]  }
 0x5c2   : > { %v2877_v6 = vpop.f32.mrf.mxu1 }
 0x5c3   : > { %v3564_v49 = vadd.f32 %v1670_v45, %v3516_v25  ;;  %v1668_v50 = vadd.f32 %v1651_v48, %v1639_v47  ;;  %v1642_v51 = vadd.f32 %v2877_v6, %v1534_v44 }
 0x5c4   : > { %v1627_v53 = vpop.f32.mrf.mxu1 }
 0x5c5   : > { %vm1686_vm10 = vcmp.ge.f32.partialorder %v3564_v49, 0.0  ;;  %v1690_v54 = vmul.f32 0.01, %v3564_v49  ;;  %v3569_v55 = vadd.f32 %v1668_v50, %v3521_v31  ;;  %v1671_v56 = vadd.f32 %v1666_v2, %v1642_v51 }
 0x5c6   : > { %v1640_v57 = vadd.f32 %v1627_v53, %v1526_v52 }
 0x5c7   : > { %v1694_v59 = vsel %vm1686_vm10, %v3564_v49, %v1690_v54  ;;  %vm1684_vm11 = vcmp.ge.f32.partialorder %v3569_v55, 0.0  ;;  %v1688_v25 = vmul.f32 0.01, %v3569_v55  ;;  %v3575_v60 = vadd.f32 %v1671_v56, %v3527_v36 }
 0x5c8   : > { %v2703_v61 = vpack.c.bf16 %v1694_v59, %v1694_v59  ;;  %v1669_v62 = vadd.f32 %v1656_v58, %v1640_v57 }
 0x5c9   : > { %v1692_v63 = vsel %vm1684_vm11, %v3569_v55, %v1688_v25  ;;  %vm1687_vm12 = vcmp.ge.f32.partialorder %v3575_v60, 0.0  ;;  %v1691_v31 = vmul.f32 0.01, %v3575_v60 }
 0x5ca   : > { %1714 = vst [vmem:[#allocation2 + $0x1c] sm:$0xf] %v2703_v61  ;;  %v2701_v0 = vpack.c.bf16 %v1692_v63, %v1692_v63  ;;  %v3581_v4 = vadd.f32 %v1669_v62, %v3533_v41  ;;  %v3089_v41 = vld [vmem:[#allocation2 + $0x18] ss:$12 sps:$4 sm:$0xff]  }
 0x5cb   : > { %v1695_v5 = vsel %vm1687_vm12, %v3575_v60, %v1691_v31  ;;  %1841 = vrot.lane.b32.xlu1 %v3089_v41, %s3288_s27 }
 0x5cc   : > { %1712 = vst [vmem:[#allocation2 + $0x4] sm:$0xf] %v2701_v0  ;;  %v2704_v7 = vpack.c.bf16 %v1695_v5, %v1695_v5  ;;  %vm1685_vm13 = vcmp.ge.f32.partialorder %v3581_v4, 0.0  ;;  %v1689_v36 = vmul.f32 0.01, %v3581_v4 }
 0x5ce   : > { %1715 = vst [vmem:[#allocation2 + $0x28] sm:$0xf] %v2704_v7  ;;  %v1693_v9 = vsel %vm1685_vm13, %v3581_v4, %v1689_v36 }
 0x5cf   : > { %v2702_v10 = vpack.c.bf16 %v1693_v9, %v1693_v9 }
 0x5d1   : > { %1713 = vst [vmem:[#allocation2 + $0x10] sm:$0xf] %v2702_v10 }
 0x5d5   : > { %v3086_v11 = vld [vmem:[#allocation2 + $0x1c] ss:$12 sps:$4 sm:$0xff]  }
 0x5d6   : > { %v3087_v12 = vld [vmem:[#allocation2 + $0x1c] ss:$12 sps:$4 sm:$0xff]   ;;  %2878 = vmatprep.subr.bf16.mxu0 %v3086_v11 }
 0x5d7   : > { %1843 = vrot.lane.b32.xlu0 %v3087_v12, %s3288_s27  ;;  %2879 = vmatpush3.bf16.msra.mxu0 %v3086_v11  ;;  %v3093_v16 = vld [vmem:[#allocation2 + $0x1c] ss:$12 sps:$4 sm:$0xff]  }
 0x5d8   : > { %v3090_v14 = vld [vmem:[#allocation2 + $0x4] ss:$12 sps:$4 sm:$0xff]   ;;  %1944 = vrot.lane.b32.xlu1 %v3093_v16, %s3289_s29 }
 0x5d9   : > { %2880 = vmatprep.subr.bf16.mxu0 %v3090_v14  ;;  %v3094_v18 = vld [vmem:[#allocation2 + $0x4] ss:$12 sps:$4 sm:$0xff]  }
 0x5da   : > { %v3099_v22 = vld [vmem:[#allocation2 + $0x4] ss:$12 sps:$4 sm:$0xff]  }
 0x5db   : > { %1946 = vrot.lane.b32.xlu0 %v3091_v15, %s3289_s29  ;;  %2881 = vmatpush3.bf16.msra.mxu0 %v3090_v14 }
 0x5dc   : > { %1837 = vrot.lane.b32.xlu1 %v3096_v19, %s3288_s27  ;;  %v3120_v19 = vld [vmem:[#allocation6 + $0x100] sm:$0xff]  }
 0x5de   : > { %2883 = vmatmul.mubr.msk.bf16.vlgmr.msra.gmra.mxu0 %vm304_vm6, %v3101_v17 }
 0x5df   : > { %1839 = vrot.lane.b32.xlu0 %v3094_v18, %s3288_s27  ;;  %2898 = vmatprep.mubr.msk.bf16.mxu0 %vm304_vm6, %v3104_v20 }
 0x5e0   : > { %1940 = vrot.lane.b32.xlu1 %v3099_v22, %s3289_s29 }
 0x5e3   : > { %1942 = vrot.lane.b32.xlu0 %v3097_v21, %s3289_s29 }
 0x5e4   : > { %2029 = vperm.xlu1 %3007, %v2015_v24   ;;  %v3109_v24 = vld [vmem:[#allocation2 + $0x18] ss:$12 sps:$4 sm:$0xff]  }
 0x5e7   : > { %2034 = vperm.xlu0 %3006, %v2016_v23  }
 0x5e8   : > { %2019 = vperm.xlu1 %3007, %v2013_v27  }
 0x5eb   : > { %2024 = vperm.xlu0 %3006, %v2014_v26   ;;  %v3122_v26 = vld [vmem:[#allocation6 + $0xf0] sm:$0xff]  }
 0x5ec   : > { %2198 = vrot.lane.b32.xlu1 %v3109_v24, %s3285_s20 }
 0x63d   : > { %v1842_v28 = vpop.permute.xlu1 %1841 }
 0x649   : > { %v1844_v29 = vpop.permute.xlu0 %1843 }
 0x64a   : > { %v1847_v30 = vsel %vm1845_vm14, %v1842_v28, %v1844_v29  ;;  %v1945_v32 = vpop.permute.xlu1 %1944  ;;  %v3111_v28 = vld [vmem:[#allocation2 + $0x20] ss:$12 sps:$4 sm:$0xff]  }
 0x64b   : > { %2886 = vmatprep.subr.bf16.mxu1 %v1847_v30 }
 0x64c   : > { %2887 = vmatpush3.bf16.msra.mxu1 %v1847_v30  ;;  %v3121_v30 = vld [vmem:[#allocation6 + $0x108] sm:$0xff]  }
 0x64d   : > { %v1947_v33 = vpop.permute.xlu0 %1946 }
 0x64e   : > { %v1950_v34 = vsel %vm1948_vm15, %v1945_v32, %v1947_v33  ;;  %v1838_v35 = vpop.permute.xlu1 %1837  ;;  %v3116_v33 = vld [vmem:[#allocation2] ss:$12 sps:$4 sm:$0xff]  }
 0x64f   : > { %2894 = vmatprep.subr.bf16.mxu0 %v1950_v34 }
 0x650   : > { %2895 = vmatpush3.bf16.msra.mxu0 %v1950_v34  ;;  %v3124_v34 = vld [vmem:[#allocation6 + $0x110] sm:$0xff]  }
 0x651   : > { %v1840_v1 = vpop.permute.xlu0 %1839 }
 0x652   : > { %v1846_v37 = vsel %vm1845_vm14, %v1838_v35, %v1840_v1  ;;  %v1941_v39 = vpop.permute.xlu1 %1940  ;;  %v3117_v35 = vld [vmem:[#allocation2 + $0x8] ss:$12 sps:$4 sm:$0xff]  }
 0x653   : > { %2888 = vmatprep.subr.bf16.mxu1 %v1846_v37 }
 0x654   : > { %2889 = vmatpush3.bf16.msra.mxu1 %v1846_v37  ;;  %v2369_v37 = vld [vmem:[#allocation8 + $0xa8] sm:$0xff] }
 0x655   : > { %v1943_v3 = vpop.permute.xlu0 %1942 }
 0x656   : > { %v1949_v40 = vsel %vm1948_vm15, %v1941_v39, %v1943_v3  ;;  %v2371_v39 = vld [vmem:[#allocation8 + $0xb8] sm:$0xff]  ;;  %v2370_v3 = vld [vmem:[#allocation8 + $0xb0] sm:$0xff] }
 0x657   : > { %2891 = vmatmul.mubr.msk.bf16.vlgmr.msra.gmra.mxu1 %vm304_vm6, %v3103_v38  ;;  %2896 = vmatprep.subr.bf16.mxu0 %v1949_v40  ;;  %v2368_v38 = vld [vmem:[#allocation8 + $0xa0] sm:$0xff] }
 0x658   : > { %2897 = vmatpush3.bf16.msra.mxu0 %v1949_v40  ;;  %2906 = vmatprep.mubr.msk.bf16.mxu1 %vm304_vm6, %v3120_v19 }
 0x65b   : > { %2899 = vmatmul.mubr.msk.bf16.vlgmr.msra.gmra.mxu0 %vm304_vm6, %v3105_v42 }
 0x65c   : > { %2914 = vmatprep.mubr.msk.bf16.mxu0 %vm304_vm6, %v3122_v26 }
 0x65f   : > { %v2030_v46 = vpop.permute.xlu1 %2029 }
 0x662   : > { %v2035_v56 = vpop.permute.xlu0 %2034 }
 0x663   : > { %v2020_v61 = vpop.permute.xlu1 %2019 }
 0x666   : > { %v2025_v12 = vpop.permute.xlu0 %2024 }
 0x667   : > { %v2199_v40 = vpop.permute.xlu1 %2198 }
 0x69e   : > { %v2884_v43 = vpop.f32.mrf.mxu0 }
 0x6a0   : > { %v1796_v2 = vpop.f32.mrf.mxu0 }
 0x6a2   : > { %v2885_v44 = vpop.f32.mrf.mxu0 }
 0x6a4   : > { %v1799_v47 = vpop.f32.mrf.mxu0 }
 0x717   : > { %v2892_v45 = vpop.f32.mrf.mxu1 }
 0x718   : > { %v1899_v6 = vadd.f32 %v2892_v45, %v2884_v43 }
 0x719   : > { %v1890_v48 = vpop.f32.mrf.mxu1 }
 0x71a   : > { %v1891_v52 = vadd.f32 %v1890_v48, %v1796_v2 }
 0x71b   : > { %v2893_v50 = vpop.f32.mrf.mxu1  ;;  %v2900_v51 = vpop.f32.mrf.mxu0 }
 0x71c   : > { %v2010_v53 = vadd.f32 %v2900_v51, %v1899_v6  ;;  %v1902_v57 = vadd.f32 %v2893_v50, %v2885_v44  ;;  %v3123_v6 = vld [vmem:[#allocation6 + $0xf8] sm:$0xff]  }
 0x71d   : > { %v1993_v54 = vpop.f32.mrf.mxu0  ;;  %v1893_v59 = vpop.f32.mrf.mxu1 }
 0x71e   : > { %v2039_v58 = vadd.f32 %v2030_v46, %v2010_v53  ;;  %v2008_v25 = vadd.f32 %v1993_v54, %v1891_v52  ;;  %v1894_v5 = vadd.f32 %v1893_v59, %v1799_v47  ;;  %v3125_v53 = vld [vmem:[#allocation6 + $0x118] sm:$0xff]  }
 0x71f   : > { %v2901_v62 = vpop.f32.mrf.mxu0 }
 0x720   : > { %vm2043_vm0 = vcmp.ge.f32.partialorder %v2039_v58, 0.0  ;;  %v2047_v63 = vmul.f32 0.01, %v2039_v58  ;;  %v2037_v31 = vadd.f32 %v2020_v61, %v2008_v25  ;;  %v2011_v0 = vadd.f32 %v2901_v62, %v1902_v57 }
 0x721   : > { %v1996_v7 = vpop.f32.mrf.mxu0 }
 0x722   : > { %v2051_v36 = vsel %vm2043_vm0, %v2039_v58, %v2047_v63  ;;  %vm2041_vm1 = vcmp.ge.f32.partialorder %v2037_v31, 0.0  ;;  %v2045_v8 = vmul.f32 0.01, %v2037_v31  ;;  %v2040_v9 = vadd.f32 %v2035_v56, %v2011_v0 }
 0x723   : > { %v2707_v10 = vpack.c.bf16 %v2051_v36, %v2051_v36  ;;  %v2009_v11 = vadd.f32 %v1996_v7, %v1894_v5 }
 0x724   : > { %v2049_v41 = vsel %vm2041_vm1, %v2037_v31, %v2045_v8  ;;  %vm2044_vm2 = vcmp.ge.f32.partialorder %v2040_v9, 0.0  ;;  %v2048_v13 = vmul.f32 0.01, %v2040_v9 }
 0x725   : > { %2071 = vst [vmem:[#allocation2 + $0x1c] sm:$0xf] %v2707_v10  ;;  %v2705_v14 = vpack.c.bf16 %v2049_v41, %v2049_v41  ;;  %v2038_v15 = vadd.f32 %v2025_v12, %v2009_v11 }
 0x726   : > { %v2052_v16 = vsel %vm2044_vm2, %v2040_v9, %v2048_v13 }
 0x727   : > { %2069 = vst [vmem:[#allocation2 + $0x4] sm:$0xf] %v2705_v14  ;;  %v2708_v17 = vpack.c.bf16 %v2052_v16, %v2052_v16  ;;  %vm2042_vm3 = vcmp.ge.f32.partialorder %v2038_v15, 0.0  ;;  %v2046_v18 = vmul.f32 0.01, %v2038_v15 }
 0x729   : > { %2072 = vst [vmem:[#allocation2 + $0x28] sm:$0xf] %v2708_v17  ;;  %v2050_v20 = vsel %vm2042_vm3, %v2038_v15, %v2046_v18 }
 0x72a   : > { %v2706_v21 = vpack.c.bf16 %v2050_v20, %v2050_v20 }
 0x72c   : > { %2070 = vst [vmem:[#allocation2 + $0x10] sm:$0xf] %v2706_v21 }
 0x730   : > { %v3106_v22 = vld [vmem:[#allocation2 + $0x1c] ss:$12 sps:$4 sm:$0xff]  }
 0x731   : > { %v3107_v23 = vld [vmem:[#allocation2 + $0x1c] ss:$12 sps:$4 sm:$0xff]   ;;  %2902 = vmatprep.subr.bf16.mxu1 %v3106_v22 }
 0x732   : > { %2200 = vrot.lane.b32.xlu0 %v3107_v23, %s3285_s20  ;;  %2903 = vmatpush3.bf16.msra.mxu1 %v3106_v22  ;;  %v3113_v29 = vld [vmem:[#allocation2 + $0x1c] ss:$12 sps:$4 sm:$0xff]  }
 0x733   : > { %v3110_v27 = vld [vmem:[#allocation2 + $0x4] ss:$12 sps:$4 sm:$0xff]   ;;  %2300 = vrot.lane.b32.xlu1 %v3113_v29, %s3284_s18 }
 0x734   : > { %2904 = vmatprep.subr.bf16.mxu1 %v3110_v27  ;;  %v3114_v32 = vld [vmem:[#allocation2 + $0x4] ss:$12 sps:$4 sm:$0xff]  }
 0x735   : > { %v3119_v1 = vld [vmem:[#allocation2 + $0x4] ss:$12 sps:$4 sm:$0xff]  }
 0x736   : > { %2302 = vrot.lane.b32.xlu0 %v3111_v28, %s3284_s18  ;;  %2905 = vmatpush3.bf16.msra.mxu1 %v3110_v27 }
 0x737   : > { %2194 = vrot.lane.b32.xlu1 %v3116_v33, %s3285_s20 }
 0x739   : > { %2907 = vmatmul.mubr.msk.bf16.vlgmr.msra.gmra.mxu1 %vm304_vm6, %v3121_v30 }
 0x73a   : > { %2196 = vrot.lane.b32.xlu0 %v3114_v32, %s3285_s20  ;;  %2922 = vmatprep.mubr.msk.bf16.mxu1 %vm304_vm6, %v3124_v34 }
 0x73b   : > { %2296 = vrot.lane.b32.xlu1 %v3119_v1, %s3284_s18 }
 0x73e   : > { %2298 = vrot.lane.b32.xlu0 %v3117_v35, %s3284_s18 }
 0x73f   : > { %2374 = vperm.xlu1 %3007, %v2368_v38  }
 0x742   : > { %2379 = vperm.xlu0 %3006, %v2369_v37  }
 0x743   : > { %2384 = vperm.xlu1 %3007, %v2370_v3  }
 0x746   : > { %2389 = vperm.xlu0 %3006, %v2371_v39  }
 0x7a4   : > { %v2201_v42 = vpop.permute.xlu0 %2200 }
 0x7a5   : > { %v2203_v43 = vsel %vm394_vm8, %v2199_v40, %v2201_v42  ;;  %v2301_v2 = vpop.permute.xlu1 %2300 }
 0x7a6   : > { %2910 = vmatprep.subr.bf16.mxu0 %v2203_v43 }
 0x7a7   : > { %2911 = vmatpush3.bf16.msra.mxu0 %v2203_v43 }
 0x7a8   : > { %v2303_v44 = vpop.permute.xlu0 %2302 }
 0x7a9   : > { %v2305_v45 = vsel %vm497_vm7, %v2301_v2, %v2303_v44  ;;  %v2195_v46 = vpop.permute.xlu1 %2194 }
 0x7aa   : > { %2918 = vmatprep.subr.bf16.mxu1 %v2305_v45 }
 0x7ab   : > { %2919 = vmatpush3.bf16.msra.mxu1 %v2305_v45 }
 0x7ac   : > { %v2197_v47 = vpop.permute.xlu0 %2196 }
 0x7ad   : > { %v2202_v48 = vsel %vm394_vm8, %v2195_v46, %v2197_v47  ;;  %v2297_v50 = vpop.permute.xlu1 %2296 }
 0x7ae   : > { %2912 = vmatprep.subr.bf16.mxu0 %v2202_v48 }
 0x7af   : > { %2913 = vmatpush3.bf16.msra.mxu0 %v2202_v48 }
 0x7b0   : > { %v2299_v51 = vpop.permute.xlu0 %2298 }
 0x7b1   : > { %v2304_v52 = vsel %vm497_vm7, %v2297_v50, %v2299_v51 }
 0x7b2   : > { %2915 = vmatmul.mubr.msk.bf16.vlgmr.msra.gmra.mxu0 %vm304_vm6, %v3123_v6  ;;  %2920 = vmatprep.subr.bf16.mxu1 %v2304_v52 }
 0x7b3   : > { %2921 = vmatpush3.bf16.msra.mxu1 %v2304_v52 }
 0x7b6   : > { %2923 = vmatmul.mubr.msk.bf16.vlgmr.msra.gmra.mxu1 %vm304_vm6, %v3125_v53 }
 0x7ba   : > { %v2375_v58 = vpop.permute.xlu1 %2374 }
 0x7bd   : > { %v2380_v62 = vpop.permute.xlu0 %2379 }
 0x7be   : > { %v2385_v5 = vpop.permute.xlu1 %2384 }
 0x7c1   : > { %v2390_v17 = vpop.permute.xlu0 %2389 }
 0x7f9   : > { %v2908_v54 = vpop.f32.mrf.mxu1 }
 0x7fb   : > { %v2153_v56 = vpop.f32.mrf.mxu1 }
 0x7fd   : > { %v2909_v57 = vpop.f32.mrf.mxu1 }
 0x7ff   : > { %v2156_v25 = vpop.f32.mrf.mxu1 }
 0x872   : > { %v2916_v59 = vpop.f32.mrf.mxu0 }
 0x873   : > { %v2255_v63 = vadd.f32 %v2916_v59, %v2908_v54 }
 0x874   : > { %v2246_v61 = vpop.f32.mrf.mxu0 }
 0x875   : > { %v2247_v7 = vadd.f32 %v2246_v61, %v2153_v56 }
 0x876   : > { %v2917_v31 = vpop.f32.mrf.mxu0  ;;  %v2924_v0 = vpop.f32.mrf.mxu1 }
 0x877   : > { %v2365_v36 = vadd.f32 %v2924_v0, %v2255_v63  ;;  %v2258_v10 = vadd.f32 %v2917_v31, %v2909_v57 }
 0x878   : > { %v2249_v8 = vpop.f32.mrf.mxu0  ;;  %v2348_v9 = vpop.f32.mrf.mxu1 }
 0x879   : > { %v2394_v11 = vadd.f32 %v2385_v5, %v2365_v36  ;;  %v2363_v12 = vadd.f32 %v2348_v9, %v2247_v7  ;;  %v2250_v14 = vadd.f32 %v2249_v8, %v2156_v25 }
 0x87a   : > { %v2925_v41 = vpop.f32.mrf.mxu1 }
 0x87b   : > { %v2398_v13 = vadd.f32 %v2394_v11, %v3564_v49  ;;  %v2392_v15 = vadd.f32 %v2375_v58, %v2363_v12  ;;  %v2366_v16 = vadd.f32 %v2925_v41, %v2258_v10 }
 0x87c   : > { %v2351_v18 = vpop.f32.mrf.mxu1 }
 0x87d   : > { %2402 = vst [vmem:[%s217_s4 + $0x10] sm:$0xff] %v2398_v13  ;;  %v2396_v19 = vadd.f32 %v2392_v15, %v3569_v55  ;;  %v2395_v20 = vadd.f32 %v2390_v17, %v2366_v16  ;;  %v2364_v21 = vadd.f32 %v2351_v18, %v2250_v14 }
 0x87f   : > { %2400 = vst [vmem:[%s217_s4] sm:$0xff] %v2396_v19  ;;  %v2399_v22 = vadd.f32 %v2395_v20, %v3575_v60  ;;  %v2393_v49 = vadd.f32 %v2380_v62, %v2364_v21 }
 0x881   : > { %2403 = vst [vmem:[%s217_s4 + $0x18] sm:$0xff] %v2399_v22  ;;  %v2397_v55 = vadd.f32 %v2393_v49, %v3581_v4 }
 0x883   : > { %2401 = vst [vmem:[%s217_s4 + $0x8] sm:$0xff] %v2397_v55 }
 0x884   : > { %3219 = shalt.err (!%p3216_p9)
}
 0x885   : > { %s3220_s30 = scalar_lea.hbm %s3620_s25, 512  ;;  %s3224_s5 = scalar_lea.hbm %s3668_s3, 2048 }
 0x886   : > { %p3221_p12 = scmp.ne.s32.totalorder %s3620_s25, %s3220_s30  ;;  %p3225_p4 = scmp.lt.s32.totalorder %s3620_s25, %s3668_s3 }
 0x887   : > { %p3226_p8 = scmp.lt.s32.totalorder %s3224_s5, %s3220_s30 }
 0x888   : > { %p3222_p3 = pnand %p3221_p12, %p3684_p0 }
 0x889   : > { %p3227_p7 = por %p3226_p8, %p3225_p4 }
 0x88a   : > { %p3223_p13 = pneg %p3222_p3 }
 0x88c   : > { %p3228_p10 = pnand %p3227_p7, %p3223_p13 }
 0x88e   : > { %3231 = shalt.err (!%p3228_p10)
}
 0x88f   : > { %s3291_s29 = smov 128   ;;  %s3292_s4 = smov 8  }
 0x890   : > { %2936 = dma.vmem_to_hbm [thread:$0]  (%p3684_p0), %s3622_s23, 512, %s3620_s25, %s2405_s16, %s3291_s29, %s3291_s29, %s3292_s4  }
 0x891 PF: > { %p2958_p1 = scmp.ge.s32.totalorder %s3274_s15, 2  ;;  %s2433_s11 = sand.u32 1, %s3262_s12  }
 0x892   : > { %p3685_p2 = scmp.ne.s32.totalorder %s3674_s19, 0  ;;  %s2434_s24 = scalar_lea.sflag [#allocation5], %s2433_s11 }
 0x894   : > { %p2950_p6 = pnand %p2958_p1, %p3685_p2 }
 0x896   : > { %p2951_p11 = pneg %p2950_p6 }
 0x898   : > { %3257 = dma.done.wait (%p2951_p11), %s2434_s24, 512  }
 0x899   : > { %3259 = vsyncadd (%p2951_p11), %s2434_s24, 4294966784  ;;  %p17_p5 = scmp.ge.s32.totalorder %s3387_s9, 6   ;;  %s3686_s12 = smov %s3266_s13 }
 0x89a   : > { %s3687_s13 = smov %s3270_s14  ;;  %s3688_s14 = smov %s3396_s17 }
 0x89b   : > { %s3689_s15 = smov %s3387_s9  ;;  %19 = sbr.rel (!%p17_p5) target bundleno = 6 (0x6), region = 107 }
 0x8a0   :  { %2439 = vsyncpa [#allocation4], 1 }
 0x8a1   :  { %2441 = vsyncpa [#allocation4 + $0x1], 1 }
 0x8a2   :  { %2442 = vsyncpa [#allocation7], 1 }
 0x8a3   :  { %2443 = vsyncpa [#allocation5], 1 }
 0x8a4   :  { %2445 = vsyncpa [#allocation5 + $0x1], 1 }

</bundles_post_ra>
